<compile_context>
chip_gen: v7x
topology: tpu7x:2x2x1
jax: 0.10.0
libtpu: 0.0.40
codegen_flags: <defaults>
</compile_context>

<pallas_src>
import functools

import jax
import jax.numpy as jnp
from jax.experimental import pallas as pl
from jax.experimental.pallas import tpu as pltpu


def _round_up(x, m):
    return (x + m - 1) // m * m


def _sgu_kernel(nc_real,
                tgt_ref, tn2_ref, srcT_ref, sn2_ref, feat_ref,
                w1s_ref, b1s_ref, w2s_ref, b2s_ref,
                w1uf_ref, w1us_ref, b1u_ref, w2u_ref, b2u_ref,
                up_ref, logits_ref):
    t = pl.program_id(1)

    feat = feat_ref[0]            # [M, C]   (mxu dtype; resident per batch elem)

    # ---- semantic head MLP: computed once per batch element (tile 0 only) ----
    @pl.when(t == 0)
    def _():
        h = jnp.dot(feat, w1s_ref[...], preferred_element_type=jnp.float32) + b1s_ref[...]
        h = jnp.maximum(h, 0.0)
        lg = jnp.dot(h.astype(w2s_ref.dtype), w2s_ref[...],
                     preferred_element_type=jnp.float32) + b2s_ref[...]
        logits_ref[0] = lg.astype(logits_ref.dtype)

    logits = logits_ref[0]        # [M, NCP] f32 (padded columns are exactly 0)

    tgt = tgt_ref[0]              # [TN, 3] f32
    srcT = srcT_ref[0]            # [3, M]  f32
    TN = tgt.shape[0]
    M = srcT.shape[1]
    NCP = logits.shape[1]

    # ---- cdist: |t|^2 + |s|^2 - 2 t.s  (cross term on the MXU) --------------
    cross = jnp.dot(tgt, srcT, preferred_element_type=jnp.float32)      # [TN, M]
    d2 = tn2_ref[0] + sn2_ref[0] - 2.0 * cross
    work = jnp.sqrt(jnp.maximum(d2, 0.0))                               # [TN, M]

    col = jax.lax.broadcasted_iota(jnp.int32, (TN, M), 1)
    if nc_real < NCP:
        lane = jax.lax.broadcasted_iota(jnp.int32, (TN, NCP), 1)
        sem_mask = lane < nc_real
    else:
        sem_mask = None

    # ---- streaming top-3 (no materialized one-hots kept across steps) -------
    # d0 <= d1 <= d2, so softmax(-d) stabilizes with max = -d0:
    #   u_k = exp(d0 - d_k),  w_k = u_k / sum_j u_j
    gsel = jnp.zeros((TN, M), jnp.float32)      # sum_k u_k * onehot_k
    denom = jnp.zeros((TN, 1), jnp.float32)
    sem_acc = jnp.zeros((TN, NCP), jnp.float32)
    d0 = None
    for k in range(3):
        mn = jnp.min(work, axis=1, keepdims=True)                             # [TN,1]
        idx = jnp.min(jnp.where(work == mn, col, M), axis=1, keepdims=True)   # first occurrence
        oh = (col == idx).astype(jnp.float32)                                 # [TN,M] transient
        if k == 0:
            d0 = mn
            u = jnp.ones_like(mn)
        else:
            u = jnp.exp(d0 - mn)
        gsel = gsel + u * oh
        denom = denom + u

        # gather the k-th neighbor's logits (exact one-hot matmul, f32) and
        # accumulate its class softmax (only over the real nc columns).
        sk = jnp.dot(oh, logits, preferred_element_type=jnp.float32)          # [TN, NCP]
        if sem_mask is not None:
            sk = jnp.where(sem_mask, sk, jnp.float32(-1e30))
        sk = sk - jnp.max(sk, axis=1, keepdims=True)
        ek = jnp.exp(sk)
        sem_acc = sem_acc + ek / jnp.sum(ek, axis=1, keepdims=True)

        if k < 2:
            work = jnp.where(col == idx, jnp.float32(1e30), work)

    sem_w = sem_acc * jnp.float32(1.0 / 3.0)                                  # [TN, NCP]

    # fused features = softmax-weighted gather expressed as one MXU matmul
    fused = jnp.dot(gsel.astype(feat.dtype), feat,
                    preferred_element_type=jnp.float32) / denom               # [TN, C]

    # ---- upsample MLP on concat([fused, sem_w]) (split matmul, same math) ---
    hu = (jnp.dot(fused.astype(w1uf_ref.dtype), w1uf_ref[...],
                  preferred_element_type=jnp.float32)
          + jnp.dot(sem_w.astype(w1us_ref.dtype), w1us_ref[...],
                    preferred_element_type=jnp.float32)
          + b1u_ref[...])
    hu = jnp.maximum(hu, 0.0)
    up = jnp.dot(hu.astype(w2u_ref.dtype), w2u_ref[...],
                 preferred_element_type=jnp.float32) + b2u_ref[...]
    up_ref[0] = up.astype(up_ref.dtype)


@functools.partial(jax.jit, static_argnames=("tile_n", "mxu_dtype"))
def semantic_guided_upsampling(src_points, tgt_points, src_features, params,
                               *, tile_n=256, mxu_dtype=jnp.bfloat16):
    B, M, _ = src_points.shape
    _, N, _ = tgt_points.shape
    C = src_features.shape[-1]
    nc = params["w2s"].shape[-1]
    out_dim = params["w2u"].shape[-1]
    f32 = jnp.float32

    NCP = _round_up(max(nc, 1), 128)        # lane-dense logits / sem_w
    ODP = _round_up(max(out_dim, 1), 128)   # lane-dense upsampled output
    TN = min(_round_up(tile_n, 8), _round_up(N, 8))
    N_pad = _round_up(N, TN)
    n_tiles = N_pad // TN

    # Coordinate-side tensors stay f32 (kNN selection precision); norms are
    # precomputed here so the kernel's distance pass is add+sub+sqrt + 1 matmul.
    tgt_pad = jnp.pad(tgt_points.astype(f32), ((0, 0), (0, N_pad - N), (0, 0)))
    tn2 = jnp.sum(tgt_pad * tgt_pad, axis=-1, keepdims=True)        # [B, N_pad, 1]
    src_t = jnp.transpose(src_points.astype(f32), (0, 2, 1))        # [B, 3, M]
    sn2 = jnp.sum(src_t * src_t, axis=1, keepdims=True)             # [B, 1, M]

    feat = src_features.astype(mxu_dtype)

    def padw(w, rows_to, cols_to):
        r, c = w.shape
        return jnp.pad(w, ((0, rows_to - r), (0, cols_to - c)))

    w1s = params["w1s"].astype(mxu_dtype)                       # [C, 128]
    b1s = params["b1s"].astype(f32)
    w2s = padw(params["w2s"], 128, NCP).astype(mxu_dtype)       # [128, NCP]
    b2s = padw(params["b2s"], 1, NCP).astype(f32)
    w1uf = params["w1u_f"].astype(mxu_dtype)                    # [C, 256]
    w1us = padw(params["w1u_s"], NCP, 256).astype(mxu_dtype)    # zero rows for padded classes
    b1u = params["b1u"].astype(f32)
    w2u = padw(params["w2u"], 256, ODP).astype(mxu_dtype)       # [256, ODP]
    b2u = padw(params["b2u"], 1, ODP).astype(f32)

    # Weights / per-batch tensors have index_maps independent of the tile index
    # so they stay VMEM-resident instead of being re-DMA'd each grid step.
    in_specs = [
        pl.BlockSpec((1, TN, 3), lambda b, t: (b, t, 0)),      # tgt points tile
        pl.BlockSpec((1, TN, 1), lambda b, t: (b, t, 0)),      # |tgt|^2 tile
        pl.BlockSpec((1, 3, M), lambda b, t: (b, 0, 0)),       # src points^T
        pl.BlockSpec((1, 1, M), lambda b, t: (b, 0, 0)),       # |src|^2
        pl.BlockSpec((1, M, C), lambda b, t: (b, 0, 0)),       # src features
        pl.BlockSpec((C, 128), lambda b, t: (0, 0)),           # w1s
        pl.BlockSpec((1, 128), lambda b, t: (0, 0)),           # b1s
        pl.BlockSpec((128, NCP), lambda b, t: (0, 0)),         # w2s (padded)
        pl.BlockSpec((1, NCP), lambda b, t: (0, 0)),           # b2s (padded)
        pl.BlockSpec((C, 256), lambda b, t: (0, 0)),           # w1u feature part
        pl.BlockSpec((NCP, 256), lambda b, t: (0, 0)),         # w1u semantic part (padded rows)
        pl.BlockSpec((1, 256), lambda b, t: (0, 0)),           # b1u
        pl.BlockSpec((256, ODP), lambda b, t: (0, 0)),         # w2u (padded)
        pl.BlockSpec((1, ODP), lambda b, t: (0, 0)),           # b2u (padded)
    ]
    out_specs = (
        pl.BlockSpec((1, TN, ODP), lambda b, t: (b, t, 0)),    # upsampled tile
        pl.BlockSpec((1, M, NCP), lambda b, t: (b, 0, 0)),     # logits: resident across tiles
    )
    out_shape = (
        jax.ShapeDtypeStruct((B, N_pad, ODP), f32),
        jax.ShapeDtypeStruct((B, M, NCP), f32),
    )

    up_pad, logits_pad = pl.pallas_call(
        functools.partial(_sgu_kernel, nc),
        out_shape=out_shape,
        grid_spec=pltpu.PrefetchScalarGridSpec(
            num_scalar_prefetch=0,
            grid=(B, n_tiles),
            in_specs=in_specs,
            out_specs=out_specs,
        ),
        compiler_params=pltpu.CompilerParams(
            # B is parallel (megacore); tile axis must stay sequential because
            # the logits output block is written at tile 0 and read by later
            # tiles of the same batch element.
            dimension_semantics=("parallel", "arbitrary"),
            vmem_limit_bytes=64 * 1024 * 1024,
        ),
    )(tgt_pad, tn2, src_t, sn2, feat,
      w1s, b1s, w2s, b2s, w1uf, w1us, b1u, w2u, b2u)

    return up_pad[:, :N, :out_dim], logits_pad[:, :, :nc]


# ------------------------- pure-JAX reference --------------------------------
def reference(src_points, tgt_points, src_features, p):
    h = jnp.maximum(src_features @ p["w1s"] + p["b1s"], 0.0)
    logits = h @ p["w2s"] + p["b2s"]                                   # [B,M,nc]

    diff = tgt_points[:, :, None, :] - src_points[:, None, :, :]       # [B,N,M,3]
    dists = jnp.sqrt(jnp.maximum(jnp.sum(diff * diff, -1), 0.0))       # [B,N,M]
    neg_d, idx = jax.lax.top_k(-dists, 3)                              # [B,N,3]
    knn_d = -neg_d

    gather = jax.vmap(lambda f, i: f[i])                               # [M,*],[N,3]->[N,3,*]
    knn_feat = gather(src_features, idx)                               # [B,N,3,C]
    knn_sem = gather(logits, idx)                                      # [B,N,3,nc]

    w = jax.nn.softmax(-knn_d, axis=-1)                                # [B,N,3]
    sem_w = jnp.mean(jax.nn.softmax(knn_sem, axis=-1), axis=2)         # [B,N,nc]
    fused = jnp.einsum('bnkd,bnk->bnd', knn_feat, w)                   # [B,N,C]

    w1u = jnp.concatenate([p["w1u_f"], p["w1u_s"]], axis=0)
    combined = jnp.concatenate([fused, sem_w], axis=-1)
    hu = jnp.maximum(combined @ w1u + p["b1u"], 0.0)
    up = hu @ p["w2u"] + p["b2u"]
    return up, logits


def init_params(key, in_dim, out_dim, num_classes):
    ks = jax.random.split(key, 12)

    def lin(kw, kb, fi, fo):
        bound = 1.0 / (fi ** 0.5)
        W = jax.random.uniform(kw, (fi, fo), jnp.float32, -bound, bound)
        b = jax.random.uniform(kb, (1, fo), jnp.float32, -bound, bound)
        return W, b

    w1s, b1s = lin(ks[0], ks[1], in_dim, 128)
    w2s, b2s = lin(ks[2], ks[3], 128, num_classes)
    w1u, b1u = lin(ks[4], ks[5], in_dim + num_classes, 256)
    w2u, b2u = lin(ks[6], ks[7], 256, out_dim)
    # feature_proj from __init__ is never used in forward(); omitted.
    return dict(w1s=w1s, b1s=b1s, w2s=w2s, b2s=b2s,
                w1u_f=w1u[:in_dim], w1u_s=w1u[in_dim:], b1u=b1u,
                w2u=w2u, b2u=b2u)


if __name__ == "__main__":
    B, M, N = 2, 16, 16
    in_dim, out_dim, num_classes = 32, 64, 8

    key = jax.random.PRNGKey(0)
    k_src, k_tgt, k_feat, k_par = jax.random.split(key, 4)
    src_points = jax.random.normal(k_src, (B, M, 3), jnp.float32)
    tgt_points = jax.random.normal(k_tgt, (B, N, 3), jnp.float32)
    src_features = jax.random.normal(k_feat, (B, M, in_dim), jnp.float32)
    params = init_params(k_par, in_dim, out_dim, num_classes)

    up_ref, logits_ref_vals = reference(src_points, tgt_points, src_features, params)

    # f32 MXU path (tight check). tile_n=8 -> 2 N-tiles per batch element, which
    # exercises the resident-logits / tiled-output pipeline.
    up32, lg32 = semantic_guided_upsampling(src_points, tgt_points, src_features,
                                            params, tile_n=8, mxu_dtype=jnp.float32)
    jax.block_until_ready((up32, lg32))
    assert up32.shape == (B, N, out_dim) and lg32.shape == (B, M, num_classes)
    assert jnp.allclose(lg32, logits_ref_vals, atol=5e-3, rtol=5e-3)
    assert jnp.allclose(up32, up_ref, atol=5e-3, rtol=5e-3)

    # bf16 MXU operands (perf default for v6e/v7x), f32 accumulation & elementwise.
    upbf, lgbf = semantic_guided_upsampling(src_points, tgt_points, src_features,
                                            params, tile_n=8, mxu_dtype=jnp.bfloat16)
    jax.block_until_ready((upbf, lgbf))
    assert upbf.shape == (B, N, out_dim) and lgbf.shape == (B, M, num_classes)
    assert jnp.allclose(lgbf, logits_ref_vals, atol=3e-2, rtol=3e-2)
    assert jnp.allclose(upbf, up_ref, atol=5e-2, rtol=5e-2)

    print("KERNEL_OK")
</pallas_src>

<mosaic_0001>
module attributes {stable_mosaic.version = 11 : i64} {
  func.func @_sgu_kernel(%arg0: i32, %arg1: i32, %arg2: memref<1x8x3xf32, #tpu.memory_space<vmem>>, %arg3: memref<1x8x1xf32, #tpu.memory_space<vmem>>, %arg4: memref<1x3x16xf32, #tpu.memory_space<vmem>>, %arg5: memref<1x1x16xf32, #tpu.memory_space<vmem>>, %arg6: memref<1x16x32xf32, #tpu.memory_space<vmem>>, %arg7: memref<32x128xf32, #tpu.memory_space<vmem>>, %arg8: memref<1x128xf32, #tpu.memory_space<vmem>>, %arg9: memref<128x128xf32, #tpu.memory_space<vmem>>, %arg10: memref<1x128xf32, #tpu.memory_space<vmem>>, %arg11: memref<32x256xf32, #tpu.memory_space<vmem>>, %arg12: memref<128x256xf32, #tpu.memory_space<vmem>>, %arg13: memref<1x256xf32, #tpu.memory_space<vmem>>, %arg14: memref<256x128xf32, #tpu.memory_space<vmem>>, %arg15: memref<1x128xf32, #tpu.memory_space<vmem>>, %arg16: memref<1x8x128xf32, #tpu.memory_space<vmem>>, %arg17: memref<1x16x128xf32, #tpu.memory_space<vmem>>) attributes {dimension_semantics = [#tpu.dimension_semantics<parallel>, #tpu.dimension_semantics<arbitrary>], iteration_bounds = array<i64: 2, 2>, scalar_prefetch = 0 : i64, scratch_operands = 0 : i64, tpu.core_type = #tpu.core_type<tc>, window_params = [{transform_indices = @transform_0, window_bounds = array<i64: 1, 8, 3>}, {transform_indices = @transform_1, window_bounds = array<i64: 1, 8, 1>}, {transform_indices = @transform_2, window_bounds = array<i64: 1, 3, 16>}, {transform_indices = @transform_3, window_bounds = array<i64: 1, 1, 16>}, {transform_indices = @transform_4, window_bounds = array<i64: 1, 16, 32>}, {pipeline_mode = #tpu.pipeline_mode<synchronous>, transform_indices = @transform_5, window_bounds = array<i64: 32, 128>}, {pipeline_mode = #tpu.pipeline_mode<synchronous>, transform_indices = @transform_6, window_bounds = array<i64: 1, 128>}, {pipeline_mode = #tpu.pipeline_mode<synchronous>, transform_indices = @transform_7, window_bounds = array<i64: 128, 128>}, {pipeline_mode = #tpu.pipeline_mode<synchronous>, transform_indices = @transform_8, window_bounds = array<i64: 1, 128>}, {pipeline_mode = #tpu.pipeline_mode<synchronous>, transform_indices = @transform_9, window_bounds = array<i64: 32, 256>}, {pipeline_mode = #tpu.pipeline_mode<synchronous>, transform_indices = @transform_10, window_bounds = array<i64: 128, 256>}, {pipeline_mode = #tpu.pipeline_mode<synchronous>, transform_indices = @transform_11, window_bounds = array<i64: 1, 256>}, {pipeline_mode = #tpu.pipeline_mode<synchronous>, transform_indices = @transform_12, window_bounds = array<i64: 256, 128>}, {pipeline_mode = #tpu.pipeline_mode<synchronous>, transform_indices = @transform_13, window_bounds = array<i64: 1, 128>}, {transform_indices = @transform_14, window_bounds = array<i64: 1, 8, 128>}, {transform_indices = @transform_15, window_bounds = array<i64: 1, 16, 128>}]} {
    %c0 = arith.constant 0 : index
    %c0_0 = arith.constant 0 : index
    %c0_1 = arith.constant 0 : index
    %0 = vector.load %arg6[%c0, %c0_0, %c0_1] : memref<1x16x32xf32, #tpu.memory_space<vmem>>, vector<1x16x32xf32>
    %1 = vector.shape_cast %0 : vector<1x16x32xf32> to vector<16x32xf32>
    %c0_i32 = arith.constant 0 : i32
    %2 = arith.cmpi eq, %arg1, %c0_i32 : i32
    %3 = arith.extui %2 : i1 to i32
    %c0_i32_2 = arith.constant 0 : i32
    %4 = arith.cmpi ne, %3, %c0_i32_2 : i32
    scf.if %4 {
      %c0_65 = arith.constant 0 : index
      %c0_66 = arith.constant 0 : index
      %155 = vector.load %arg7[%c0_65, %c0_66] : memref<32x128xf32, #tpu.memory_space<vmem>>, vector<32x128xf32>
      %cst_67 = arith.constant dense<0.000000e+00> : vector<16x128xf32>
      %156 = tpu.matmul %1, %155, %cst_67 {dimension_numbers = #tpu.dot_dimension_numbers<[1], [0], [0], [1], [0, 0, 1, 1], [], []>} : vector<16x32xf32>, vector<32x128xf32>, vector<16x128xf32> -> vector<16x128xf32>
      %c0_68 = arith.constant 0 : index
      %c0_69 = arith.constant 0 : index
      %157 = vector.load %arg8[%c0_68, %c0_69] : memref<1x128xf32, #tpu.memory_space<vmem>>, vector<1x128xf32>
      %158 = vector.broadcast %157 : vector<1x128xf32> to vector<16x128xf32>
      %159 = arith.addf %156, %158 : vector<16x128xf32>
      %cst_70 = arith.constant 0.000000e+00 : f32
      %160 = vector.broadcast %cst_70 : f32 to vector<16x128xf32>
      %161 = arith.maximumf %159, %160 : vector<16x128xf32>
      %c0_71 = arith.constant 0 : index
      %c0_72 = arith.constant 0 : index
      %162 = vector.load %arg9[%c0_71, %c0_72] : memref<128x128xf32, #tpu.memory_space<vmem>>, vector<128x128xf32>
      %cst_73 = arith.constant dense<0.000000e+00> : vector<16x128xf32>
      %163 = tpu.matmul %161, %162, %cst_73 {dimension_numbers = #tpu.dot_dimension_numbers<[1], [0], [0], [1], [0, 0, 1, 1], [], []>} : vector<16x128xf32>, vector<128x128xf32>, vector<16x128xf32> -> vector<16x128xf32>
      %c0_74 = arith.constant 0 : index
      %c0_75 = arith.constant 0 : index
      %164 = vector.load %arg10[%c0_74, %c0_75] : memref<1x128xf32, #tpu.memory_space<vmem>>, vector<1x128xf32>
      %165 = vector.broadcast %164 : vector<1x128xf32> to vector<16x128xf32>
      %166 = arith.addf %163, %165 : vector<16x128xf32>
      %c0_76 = arith.constant 0 : index
      %c0_77 = arith.constant 0 : index
      %c0_78 = arith.constant 0 : index
      %167 = vector.load %arg17[%c0_76, %c0_77, %c0_78] : memref<1x16x128xf32, #tpu.memory_space<vmem>>, vector<1x16x128xf32>
      %168 = vector.shape_cast %167 : vector<1x16x128xf32> to vector<16x128xf32>
      %169 = vector.shape_cast %166 : vector<16x128xf32> to vector<1x16x128xf32>
      tpu.vector_store %arg17[%c0_76, %c0_77, %c0_78], %169 {strides = array<i32>} : memref<1x16x128xf32, #tpu.memory_space<vmem>>, vector<1x16x128xf32>,
    } else {
    }
    %c0_3 = arith.constant 0 : index
    %c0_4 = arith.constant 0 : index
    %c0_5 = arith.constant 0 : index
    %5 = vector.load %arg17[%c0_3, %c0_4, %c0_5] : memref<1x16x128xf32, #tpu.memory_space<vmem>>, vector<1x16x128xf32>
    %6 = vector.shape_cast %5 : vector<1x16x128xf32> to vector<16x128xf32>
    %c0_6 = arith.constant 0 : index
    %c0_7 = arith.constant 0 : index
    %c0_8 = arith.constant 0 : index
    %7 = vector.load %arg2[%c0_6, %c0_7, %c0_8] : memref<1x8x3xf32, #tpu.memory_space<vmem>>, vector<1x8x3xf32>
    %8 = vector.shape_cast %7 : vector<1x8x3xf32> to vector<8x3xf32>
    %c0_9 = arith.constant 0 : index
    %c0_10 = arith.constant 0 : index
    %c0_11 = arith.constant 0 : index
    %9 = vector.load %arg4[%c0_9, %c0_10, %c0_11] : memref<1x3x16xf32, #tpu.memory_space<vmem>>, vector<1x3x16xf32>
    %10 = vector.shape_cast %9 : vector<1x3x16xf32> to vector<3x16xf32>
    %cst = arith.constant dense<0.000000e+00> : vector<8x16xf32>
    %11 = tpu.matmul %8, %10, %cst {dimension_numbers = #tpu.dot_dimension_numbers<[1], [0], [0], [1], [0, 0, 1, 1], [], []>} : vector<8x3xf32>, vector<3x16xf32>, vector<8x16xf32> -> vector<8x16xf32>
    %c0_12 = arith.constant 0 : index
    %c0_13 = arith.constant 0 : index
    %c0_14 = arith.constant 0 : index
    %12 = vector.load %arg3[%c0_12, %c0_13, %c0_14] : memref<1x8x1xf32, #tpu.memory_space<vmem>>, vector<1x8x1xf32>
    %13 = vector.shape_cast %12 : vector<1x8x1xf32> to vector<8x1xf32>
    %c0_15 = arith.constant 0 : index
    %c0_16 = arith.constant 0 : index
    %c0_17 = arith.constant 0 : index
    %14 = vector.load %arg5[%c0_15, %c0_16, %c0_17] : memref<1x1x16xf32, #tpu.memory_space<vmem>>, vector<1x1x16xf32>
    %15 = vector.shape_cast %14 : vector<1x1x16xf32> to vector<1x16xf32>
    %16 = vector.broadcast %13 : vector<8x1xf32> to vector<8x16xf32>
    %17 = vector.broadcast %15 : vector<1x16xf32> to vector<8x16xf32>
    %18 = arith.addf %16, %17 : vector<8x16xf32>
    %cst_18 = arith.constant 2.000000e+00 : f32
    %19 = vector.broadcast %cst_18 : f32 to vector<8x16xf32>
    %20 = arith.mulf %19, %11 : vector<8x16xf32>
    %21 = arith.subf %18, %20 : vector<8x16xf32>
    %cst_19 = arith.constant 0.000000e+00 : f32
    %22 = vector.broadcast %cst_19 : f32 to vector<8x16xf32>
    %23 = arith.maximumf %21, %22 : vector<8x16xf32>
    %24 = math.sqrt %23 : vector<8x16xf32>
    %25 = tpu.iota {dimensions = array<i32: 1>} : vector<8x16xi32>
    %26 = tpu.iota {dimensions = array<i32: 1>} : vector<8x128xi32>
    %c8_i32 = arith.constant 8 : i32
    %27 = vector.broadcast %c8_i32 : i32 to vector<8x128xi32>
    %28 = arith.cmpi slt, %26, %27 : vector<8x128xi32>
    %cst_20 = arith.constant 0.000000e+00 : f32
    %29 = vector.broadcast %cst_20 : f32 to vector<8x16xf32>
    %cst_21 = arith.constant 0.000000e+00 : f32
    %30 = vector.broadcast %cst_21 : f32 to vector<8x1xf32>
    %cst_22 = arith.constant 0.000000e+00 : f32
    %31 = vector.broadcast %cst_22 : f32 to vector<8x128xf32>
    %cst_23 = arith.constant dense<0x7F800000> : vector<8xf32>
    %32 = vector.multi_reduction <minimumf>, %24, %cst_23 [1] : vector<8x16xf32> to vector<8xf32>
    %33 = vector.shape_cast %32 : vector<8xf32> to vector<8x1xf32>
    %34 = vector.broadcast %33 : vector<8x1xf32> to vector<8x16xf32>
    %35 = arith.cmpf oeq, %24, %34 : vector<8x16xf32>
    %c16_i32 = arith.constant 16 : i32
    %36 = vector.broadcast %c16_i32 : i32 to vector<8x16xi32>
    %37 = arith.select %35, %25, %36 : vector<8x16xi1>, vector<8x16xi32>
    %cst_24 = arith.constant dense<2147483647> : vector<8xi32>
    %38 = vector.multi_reduction <minsi>, %37, %cst_24 [1] : vector<8x16xi32> to vector<8xi32>
    %39 = vector.shape_cast %38 : vector<8xi32> to vector<8x1xi32>
    %40 = vector.broadcast %39 : vector<8x1xi32> to vector<8x16xi32>
    %41 = arith.cmpi eq, %25, %40 : vector<8x16xi32>
    %42 = arith.extui %41 : vector<8x16xi1> to vector<8x16xi32>
    %43 = arith.sitofp %42 : vector<8x16xi32> to vector<8x16xf32>
    %cst_25 = arith.constant 1.000000e+00 : f32
    %44 = vector.broadcast %cst_25 : f32 to vector<8x1xf32>
    %45 = vector.broadcast %44 : vector<8x1xf32> to vector<8x16xf32>
    %46 = arith.mulf %45, %43 : vector<8x16xf32>
    %47 = arith.addf %29, %46 : vector<8x16xf32>
    %48 = arith.addf %30, %44 : vector<8x1xf32>
    %cst_26 = arith.constant dense<0.000000e+00> : vector<8x128xf32>
    %49 = tpu.matmul %43, %6, %cst_26 {dimension_numbers = #tpu.dot_dimension_numbers<[1], [0], [0], [1], [0, 0, 1, 1], [], []>} : vector<8x16xf32>, vector<16x128xf32>, vector<8x128xf32> -> vector<8x128xf32>
    %cst_27 = arith.constant -1.000000e+30 : f32
    %50 = vector.broadcast %cst_27 : f32 to vector<8x128xf32>
    %51 = arith.select %28, %49, %50 : vector<8x128xi1>, vector<8x128xf32>
    %cst_28 = arith.constant dense<0xFF800000> : vector<8xf32>
    %52 = vector.multi_reduction <maximumf>, %51, %cst_28 [1] : vector<8x128xf32> to vector<8xf32>
    %53 = vector.shape_cast %52 : vector<8xf32> to vector<8x1xf32>
    %54 = vector.broadcast %53 : vector<8x1xf32> to vector<8x128xf32>
    %55 = arith.subf %51, %54 : vector<8x128xf32>
    %56 = math.exp %55 : vector<8x128xf32>
    %cst_29 = arith.constant dense<0.000000e+00> : vector<8xf32>
    %57 = vector.multi_reduction <add>, %56, %cst_29 [1] : vector<8x128xf32> to vector<8xf32>
    %58 = vector.shape_cast %57 : vector<8xf32> to vector<8x1xf32>
    %59 = vector.broadcast %58 : vector<8x1xf32> to vector<8x128xf32>
    %60 = arith.divf %56, %59 : vector<8x128xf32>
    %61 = arith.addf %31, %60 : vector<8x128xf32>
    %62 = vector.broadcast %39 : vector<8x1xi32> to vector<8x16xi32>
    %63 = arith.cmpi eq, %25, %62 : vector<8x16xi32>
    %cst_30 = arith.constant 1.000000e+30 : f32
    %64 = vector.broadcast %cst_30 : f32 to vector<8x16xf32>
    %65 = arith.select %63, %64, %24 : vector<8x16xi1>, vector<8x16xf32>
    %cst_31 = arith.constant dense<0x7F800000> : vector<8xf32>
    %66 = vector.multi_reduction <minimumf>, %65, %cst_31 [1] : vector<8x16xf32> to vector<8xf32>
    %67 = vector.shape_cast %66 : vector<8xf32> to vector<8x1xf32>
    %68 = vector.broadcast %67 : vector<8x1xf32> to vector<8x16xf32>
    %69 = arith.cmpf oeq, %65, %68 : vector<8x16xf32>
    %c16_i32_32 = arith.constant 16 : i32
    %70 = vector.broadcast %c16_i32_32 : i32 to vector<8x16xi32>
    %71 = arith.select %69, %25, %70 : vector<8x16xi1>, vector<8x16xi32>
    %cst_33 = arith.constant dense<2147483647> : vector<8xi32>
    %72 = vector.multi_reduction <minsi>, %71, %cst_33 [1] : vector<8x16xi32> to vector<8xi32>
    %73 = vector.shape_cast %72 : vector<8xi32> to vector<8x1xi32>
    %74 = vector.broadcast %73 : vector<8x1xi32> to vector<8x16xi32>
    %75 = arith.cmpi eq, %25, %74 : vector<8x16xi32>
    %76 = arith.extui %75 : vector<8x16xi1> to vector<8x16xi32>
    %77 = arith.sitofp %76 : vector<8x16xi32> to vector<8x16xf32>
    %78 = arith.subf %33, %67 : vector<8x1xf32>
    %79 = math.exp %78 : vector<8x1xf32>
    %80 = vector.broadcast %79 : vector<8x1xf32> to vector<8x16xf32>
    %81 = arith.mulf %80, %77 : vector<8x16xf32>
    %82 = arith.addf %47, %81 : vector<8x16xf32>
    %83 = arith.addf %48, %79 : vector<8x1xf32>
    %cst_34 = arith.constant dense<0.000000e+00> : vector<8x128xf32>
    %84 = tpu.matmul %77, %6, %cst_34 {dimension_numbers = #tpu.dot_dimension_numbers<[1], [0], [0], [1], [0, 0, 1, 1], [], []>} : vector<8x16xf32>, vector<16x128xf32>, vector<8x128xf32> -> vector<8x128xf32>
    %cst_35 = arith.constant -1.000000e+30 : f32
    %85 = vector.broadcast %cst_35 : f32 to vector<8x128xf32>
    %86 = arith.select %28, %84, %85 : vector<8x128xi1>, vector<8x128xf32>
    %cst_36 = arith.constant dense<0xFF800000> : vector<8xf32>
    %87 = vector.multi_reduction <maximumf>, %86, %cst_36 [1] : vector<8x128xf32> to vector<8xf32>
    %88 = vector.shape_cast %87 : vector<8xf32> to vector<8x1xf32>
    %89 = vector.broadcast %88 : vector<8x1xf32> to vector<8x128xf32>
    %90 = arith.subf %86, %89 : vector<8x128xf32>
    %91 = math.exp %90 : vector<8x128xf32>
    %cst_37 = arith.constant dense<0.000000e+00> : vector<8xf32>
    %92 = vector.multi_reduction <add>, %91, %cst_37 [1] : vector<8x128xf32> to vector<8xf32>
    %93 = vector.shape_cast %92 : vector<8xf32> to vector<8x1xf32>
    %94 = vector.broadcast %93 : vector<8x1xf32> to vector<8x128xf32>
    %95 = arith.divf %91, %94 : vector<8x128xf32>
    %96 = arith.addf %61, %95 : vector<8x128xf32>
    %97 = vector.broadcast %73 : vector<8x1xi32> to vector<8x16xi32>
    %98 = arith.cmpi eq, %25, %97 : vector<8x16xi32>
    %cst_38 = arith.constant 1.000000e+30 : f32
    %99 = vector.broadcast %cst_38 : f32 to vector<8x16xf32>
    %100 = arith.select %98, %99, %65 : vector<8x16xi1>, vector<8x16xf32>
    %cst_39 = arith.constant dense<0x7F800000> : vector<8xf32>
    %101 = vector.multi_reduction <minimumf>, %100, %cst_39 [1] : vector<8x16xf32> to vector<8xf32>
    %102 = vector.shape_cast %101 : vector<8xf32> to vector<8x1xf32>
    %103 = vector.broadcast %102 : vector<8x1xf32> to vector<8x16xf32>
    %104 = arith.cmpf oeq, %100, %103 : vector<8x16xf32>
    %c16_i32_40 = arith.constant 16 : i32
    %105 = vector.broadcast %c16_i32_40 : i32 to vector<8x16xi32>
    %106 = arith.select %104, %25, %105 : vector<8x16xi1>, vector<8x16xi32>
    %cst_41 = arith.constant dense<2147483647> : vector<8xi32>
    %107 = vector.multi_reduction <minsi>, %106, %cst_41 [1] : vector<8x16xi32> to vector<8xi32>
    %108 = vector.shape_cast %107 : vector<8xi32> to vector<8x1xi32>
    %109 = vector.broadcast %108 : vector<8x1xi32> to vector<8x16xi32>
    %110 = arith.cmpi eq, %25, %109 : vector<8x16xi32>
    %111 = arith.extui %110 : vector<8x16xi1> to vector<8x16xi32>
    %112 = arith.sitofp %111 : vector<8x16xi32> to vector<8x16xf32>
    %113 = arith.subf %33, %102 : vector<8x1xf32>
    %114 = math.exp %113 : vector<8x1xf32>
    %115 = vector.broadcast %114 : vector<8x1xf32> to vector<8x16xf32>
    %116 = arith.mulf %115, %112 : vector<8x16xf32>
    %117 = arith.addf %82, %116 : vector<8x16xf32>
    %118 = arith.addf %83, %114 : vector<8x1xf32>
    %cst_42 = arith.constant dense<0.000000e+00> : vector<8x128xf32>
    %119 = tpu.matmul %112, %6, %cst_42 {dimension_numbers = #tpu.dot_dimension_numbers<[1], [0], [0], [1], [0, 0, 1, 1], [], []>} : vector<8x16xf32>, vector<16x128xf32>, vector<8x128xf32> -> vector<8x128xf32>
    %cst_43 = arith.constant -1.000000e+30 : f32
    %120 = vector.broadcast %cst_43 : f32 to vector<8x128xf32>
    %121 = arith.select %28, %119, %120 : vector<8x128xi1>, vector<8x128xf32>
    %cst_44 = arith.constant dense<0xFF800000> : vector<8xf32>
    %122 = vector.multi_reduction <maximumf>, %121, %cst_44 [1] : vector<8x128xf32> to vector<8xf32>
    %123 = vector.shape_cast %122 : vector<8xf32> to vector<8x1xf32>
    %124 = vector.broadcast %123 : vector<8x1xf32> to vector<8x128xf32>
    %125 = arith.subf %121, %124 : vector<8x128xf32>
    %126 = math.exp %125 : vector<8x128xf32>
    %cst_45 = arith.constant dense<0.000000e+00> : vector<8xf32>
    %127 = vector.multi_reduction <add>, %126, %cst_45 [1] : vector<8x128xf32> to vector<8xf32>
    %128 = vector.shape_cast %127 : vector<8xf32> to vector<8x1xf32>
    %129 = vector.broadcast %128 : vector<8x1xf32> to vector<8x128xf32>
    %130 = arith.divf %126, %129 : vector<8x128xf32>
    %131 = arith.addf %96, %130 : vector<8x128xf32>
    %cst_46 = arith.constant 0.333333343 : f32
    %132 = vector.broadcast %cst_46 : f32 to vector<8x128xf32>
    %133 = arith.mulf %131, %132 : vector<8x128xf32>
    %cst_47 = arith.constant dense<0.000000e+00> : vector<8x32xf32>
    %134 = tpu.matmul %117, %1, %cst_47 {dimension_numbers = #tpu.dot_dimension_numbers<[1], [0], [0], [1], [0, 0, 1, 1], [], []>} : vector<8x16xf32>, vector<16x32xf32>, vector<8x32xf32> -> vector<8x32xf32>
    %135 = vector.broadcast %118 : vector<8x1xf32> to vector<8x32xf32>
    %136 = arith.divf %134, %135 : vector<8x32xf32>
    %c0_48 = arith.constant 0 : index
    %c0_49 = arith.constant 0 : index
    %137 = vector.load %arg11[%c0_48, %c0_49] : memref<32x256xf32, #tpu.memory_space<vmem>>, vector<32x256xf32>
    %cst_50 = arith.constant dense<0.000000e+00> : vector<8x256xf32>
    %138 = tpu.matmul %136, %137, %cst_50 {dimension_numbers = #tpu.dot_dimension_numbers<[1], [0], [0], [1], [0, 0, 1, 1], [], []>} : vector<8x32xf32>, vector<32x256xf32>, vector<8x256xf32> -> vector<8x256xf32>
    %c0_51 = arith.constant 0 : index
    %c0_52 = arith.constant 0 : index
    %139 = vector.load %arg12[%c0_51, %c0_52] : memref<128x256xf32, #tpu.memory_space<vmem>>, vector<128x256xf32>
    %cst_53 = arith.constant dense<0.000000e+00> : vector<8x256xf32>
    %140 = tpu.matmul %133, %139, %cst_53 {dimension_numbers = #tpu.dot_dimension_numbers<[1], [0], [0], [1], [0, 0, 1, 1], [], []>} : vector<8x128xf32>, vector<128x256xf32>, vector<8x256xf32> -> vector<8x256xf32>
    %141 = arith.addf %138, %140 : vector<8x256xf32>
    %c0_54 = arith.constant 0 : index
    %c0_55 = arith.constant 0 : index
    %142 = vector.load %arg13[%c0_54, %c0_55] : memref<1x256xf32, #tpu.memory_space<vmem>>, vector<1x256xf32>
    %143 = vector.broadcast %142 : vector<1x256xf32> to vector<8x256xf32>
    %144 = arith.addf %141, %143 : vector<8x256xf32>
    %cst_56 = arith.constant 0.000000e+00 : f32
    %145 = vector.broadcast %cst_56 : f32 to vector<8x256xf32>
    %146 = arith.maximumf %144, %145 : vector<8x256xf32>
    %c0_57 = arith.constant 0 : index
    %c0_58 = arith.constant 0 : index
    %147 = vector.load %arg14[%c0_57, %c0_58] : memref<256x128xf32, #tpu.memory_space<vmem>>, vector<256x128xf32>
    %cst_59 = arith.constant dense<0.000000e+00> : vector<8x128xf32>
    %148 = tpu.matmul %146, %147, %cst_59 {dimension_numbers = #tpu.dot_dimension_numbers<[1], [0], [0], [1], [0, 0, 1, 1], [], []>} : vector<8x256xf32>, vector<256x128xf32>, vector<8x128xf32> -> vector<8x128xf32>
    %c0_60 = arith.constant 0 : index
    %c0_61 = arith.constant 0 : index
    %149 = vector.load %arg15[%c0_60, %c0_61] : memref<1x128xf32, #tpu.memory_space<vmem>>, vector<1x128xf32>
    %150 = vector.broadcast %149 : vector<1x128xf32> to vector<8x128xf32>
    %151 = arith.addf %148, %150 : vector<8x128xf32>
    %c0_62 = arith.constant 0 : index
    %c0_63 = arith.constant 0 : index
    %c0_64 = arith.constant 0 : index
    %152 = vector.load %arg16[%c0_62, %c0_63, %c0_64] : memref<1x8x128xf32, #tpu.memory_space<vmem>>, vector<1x8x128xf32>
    %153 = vector.shape_cast %152 : vector<1x8x128xf32> to vector<8x128xf32>
    %154 = vector.shape_cast %151 : vector<8x128xf32> to vector<1x8x128xf32>
    tpu.vector_store %arg16[%c0_62, %c0_63, %c0_64], %154 {strides = array<i32>} : memref<1x8x128xf32, #tpu.memory_space<vmem>>, vector<1x8x128xf32>,
    return
  }
  func.func @transform_0(%arg0: i32, %arg1: i32) -> (i32, i32, i32) {
    %c0_i32 = arith.constant 0 : i32
    %c0_i32_0 = arith.constant 0 : i32
    return %arg0, %arg1, %c0_i32 : i32, i32, i32
  }
  func.func @transform_1(%arg0: i32, %arg1: i32) -> (i32, i32, i32) {
    %c0_i32 = arith.constant 0 : i32
    %c0_i32_0 = arith.constant 0 : i32
    return %arg0, %arg1, %c0_i32 : i32, i32, i32
  }
  func.func @transform_2(%arg0: i32, %arg1: i32) -> (i32, i32, i32) {
    %c0_i32 = arith.constant 0 : i32
    %c0_i32_0 = arith.constant 0 : i32
    %c0_i32_1 = arith.constant 0 : i32
    return %arg0, %c0_i32, %c0_i32_0 : i32, i32, i32
  }
  func.func @transform_3(%arg0: i32, %arg1: i32) -> (i32, i32, i32) {
    %c0_i32 = arith.constant 0 : i32
    %c0_i32_0 = arith.constant 0 : i32
    %c0_i32_1 = arith.constant 0 : i32
    return %arg0, %c0_i32, %c0_i32_0 : i32, i32, i32
  }
  func.func @transform_4(%arg0: i32, %arg1: i32) -> (i32, i32, i32) {
    %c0_i32 = arith.constant 0 : i32
    %c0_i32_0 = arith.constant 0 : i32
    %c0_i32_1 = arith.constant 0 : i32
    return %arg0, %c0_i32, %c0_i32_0 : i32, i32, i32
  }
  func.func @transform_5(%arg0: i32, %arg1: i32) -> (i32, i32) {
    %c0_i32 = arith.constant 0 : i32
    %c0_i32_0 = arith.constant 0 : i32
    %c0_i32_1 = arith.constant 0 : i32
    return %c0_i32, %c0_i32_0 : i32, i32
  }
  func.func @transform_6(%arg0: i32, %arg1: i32) -> (i32, i32) {
    %c0_i32 = arith.constant 0 : i32
    %c0_i32_0 = arith.constant 0 : i32
    %c0_i32_1 = arith.constant 0 : i32
    return %c0_i32, %c0_i32_0 : i32, i32
  }
  func.func @transform_7(%arg0: i32, %arg1: i32) -> (i32, i32) {
    %c0_i32 = arith.constant 0 : i32
    %c0_i32_0 = arith.constant 0 : i32
    %c0_i32_1 = arith.constant 0 : i32
    return %c0_i32, %c0_i32_0 : i32, i32
  }
  func.func @transform_8(%arg0: i32, %arg1: i32) -> (i32, i32) {
    %c0_i32 = arith.constant 0 : i32
    %c0_i32_0 = arith.constant 0 : i32
    %c0_i32_1 = arith.constant 0 : i32
    return %c0_i32, %c0_i32_0 : i32, i32
  }
  func.func @transform_9(%arg0: i32, %arg1: i32) -> (i32, i32) {
    %c0_i32 = arith.constant 0 : i32
    %c0_i32_0 = arith.constant 0 : i32
    %c0_i32_1 = arith.constant 0 : i32
    return %c0_i32, %c0_i32_0 : i32, i32
  }
  func.func @transform_10(%arg0: i32, %arg1: i32) -> (i32, i32) {
    %c0_i32 = arith.constant 0 : i32
    %c0_i32_0 = arith.constant 0 : i32
    %c0_i32_1 = arith.constant 0 : i32
    return %c0_i32, %c0_i32_0 : i32, i32
  }
  func.func @transform_11(%arg0: i32, %arg1: i32) -> (i32, i32) {
    %c0_i32 = arith.constant 0 : i32
    %c0_i32_0 = arith.constant 0 : i32
    %c0_i32_1 = arith.constant 0 : i32
    return %c0_i32, %c0_i32_0 : i32, i32
  }
  func.func @transform_12(%arg0: i32, %arg1: i32) -> (i32, i32) {
    %c0_i32 = arith.constant 0 : i32
    %c0_i32_0 = arith.constant 0 : i32
    %c0_i32_1 = arith.constant 0 : i32
    return %c0_i32, %c0_i32_0 : i32, i32
  }
  func.func @transform_13(%arg0: i32, %arg1: i32) -> (i32, i32) {
    %c0_i32 = arith.constant 0 : i32
    %c0_i32_0 = arith.constant 0 : i32
    %c0_i32_1 = arith.constant 0 : i32
    return %c0_i32, %c0_i32_0 : i32, i32
  }
  func.func @transform_14(%arg0: i32, %arg1: i32) -> (i32, i32, i32) {
    %c0_i32 = arith.constant 0 : i32
    %c0_i32_0 = arith.constant 0 : i32
    return %arg0, %arg1, %c0_i32 : i32, i32, i32
  }
  func.func @transform_15(%arg0: i32, %arg1: i32) -> (i32, i32, i32) {
    %c0_i32 = arith.constant 0 : i32
    %c0_i32_0 = arith.constant 0 : i32
    %c0_i32_1 = arith.constant 0 : i32
    return %arg0, %c0_i32, %c0_i32_0 : i32, i32, i32
  }
}

</mosaic_0001>

<bundles_post_ra>
// kernel: semantic_guided_upsampling.1
= control target key start
LH: loop header
LB: loop body
LE: loop exit
PB: predicated region body
PF: predicated region fallthrough
CT: control target
= control target key end

     0   :  { %s4275_s0 = inlined_call_operand.hbm [shape: f32[2,16,3], index: 0, kind: input, shape index: {}]   ;;  %s4276_s1 = inlined_call_operand.hbm [shape: f32[2,16,1], index: 1, kind: input, shape index: {}]   ;;  %s4277_s2 = inlined_call_operand.hbm [shape: f32[2,3,16], index: 2, kind: input, shape index: {}]   ;;  %s4278_s3 = inlined_call_operand.hbm [shape: f32[2,1,16], index: 3, kind: input, shape index: {}]   ;;  %s4279_s4 = inlined_call_operand.hbm [shape: f32[2,16,32], index: 4, kind: input, shape index: {}]   ;;  %s4280_s5 = inlined_call_operand.hbm [shape: f32[32,128], index: 5, kind: input, shape index: {}]   ;;  %s4281_s6 = inlined_call_operand.hbm [shape: f32[1,128], index: 6, kind: input, shape index: {}]   ;;  %s4282_s7 = inlined_call_operand.hbm [shape: f32[128,128], index: 7, kind: input, shape index: {}]   ;;  %s4283_s8 = inlined_call_operand.hbm [shape: f32[1,128], index: 8, kind: input, shape index: {}]   ;;  %s4284_s9 = inlined_call_operand.hbm [shape: f32[32,256], index: 9, kind: input, shape index: {}]   ;;  %s4285_s10 = inlined_call_operand.hbm [shape: f32[128,256], index: 10, kind: input, shape index: {}]   ;;  %s4286_s11 = inlined_call_operand.hbm [shape: f32[1,256], index: 11, kind: input, shape index: {}]   ;;  %s4287_s12 = inlined_call_operand.hbm [shape: f32[256,128], index: 12, kind: input, shape index: {}]   ;;  %s4288_s13 = inlined_call_operand.hbm [shape: f32[1,128], index: 13, kind: input, shape index: {}]   ;;  %s4289_s14 = inlined_call_operand.hbm [shape: f32[2,16,128], index: 14, kind: output, shape index: {0}]   ;;  %s4290_s15 = inlined_call_operand.hbm [shape: f32[2,16,128], index: 15, kind: output, shape index: {1}]  }
   0x1   :  { %4358 = sst [smem:[#allocation59_spill]] %s4275_s0 }
   0x2   :  { %4359 = sst [smem:[#allocation60_spill]] %s4276_s1 }
   0x3   :  { %4360 = sst [smem:[#allocation61_spill]] %s4277_s2 }
   0x4   :  { %4361 = sst [smem:[#allocation62_spill]] %s4278_s3 }
   0x5   :  { %4362 = sst [smem:[#allocation63_spill]] %s4279_s4 }
   0x6   :  { %4363 = sst [smem:[#allocation64_spill]] %s4280_s5 }
   0x7   :  { %4364 = sst [smem:[#allocation65_spill]] %s4281_s6 }
   0x8   :  { %4365 = sst [smem:[#allocation66_spill]] %s4282_s7 }
   0x9   :  { %4366 = sst [smem:[#allocation67_spill]] %s4283_s8 }
   0xa   :  { %4367 = sst [smem:[#allocation68_spill]] %s4284_s9 }
   0xb   :  { %4368 = sst [smem:[#allocation69_spill]] %s4285_s10 }
   0xc   :  { %4369 = sst [smem:[#allocation70_spill]] %s4286_s11 }
   0xd   :  { %4370 = sst [smem:[#allocation71_spill]] %s4287_s12 }
   0xe   :  { %4371 = sst [smem:[#allocation72_spill]] %s4288_s13 }
   0xf   :  { %4372 = sst [smem:[#allocation73_spill]] %s4289_s14 }
  0x10   :  { %4373 = sst [smem:[#allocation74_spill]] %s4290_s15 }
  0x11   :  { %21 = vsyncpa [#allocation3], 0 }
  0x12   :  { %23 = vsyncpa [#allocation3 + $0x1], 0 }
  0x13   :  { %24 = vsyncpa [#allocation6], 0 }
  0x14   :  { %26 = vsyncpa [#allocation6 + $0x1], 0 }
  0x15   :  { %27 = vsyncpa [#allocation9], 0 }
  0x16   :  { %29 = vsyncpa [#allocation9 + $0x1], 0 }
  0x17   :  { %30 = vsyncpa [#allocation12], 0 }
  0x18   :  { %31 = vsyncpa [#allocation15], 0 }
  0x19   :  { %32 = vsyncpa [#allocation18], 0 }
  0x1a   :  { %33 = vsyncpa [#allocation21], 0 }
  0x1b   :  { %34 = vsyncpa [#allocation24], 0 }
  0x1c   :  { %35 = vsyncpa [#allocation4], 0 }
  0x1d   :  { %37 = vsyncpa [#allocation4 + $0x1], 0 }
  0x1e   :  { %38 = vsyncpa [#allocation27], 0 }
  0x1f   :  { %40 = vsyncpa [#allocation27 + $0x1], 0  ;;  %s3459_s18 = smov 0   ;;  %s3461_s19 = smov 0  }
  0x20   :  { %s3463_s20 = smov 0   ;;  %s3465_s21 = smov 0  }
  0x21   :  { %s3467_s22 = smov 0   ;;  %s3469_s23 = smov 0  }
  0x22   :  { %s3471_s24 = smov 0   ;;  %s3473_s25 = smov 0  }
  0x23   :  { %s3475_s26 = smov 0   ;;  %s3477_s27 = smov 0  }
  0x24   :  { %s3479_s28 = smov 0  }
  0x25 LB: > { %4374 = sst [smem:[#allocation39_spill]] %s3311_s18  ;;  %s3515_s29 = sadd.s32 4294967295, %s3351_s28   ;;  %s3351_s28 = sphi %s3479_s28, %s46_s28   ;;  %s3347_s27 = sphi %s3477_s27, %s4491_s27   ;;  %s3343_s26 = sphi %s3475_s26, %s4485_s26   ;;  %s3339_s25 = sphi %s3473_s25, %s4490_s25   ;;  %s3335_s24 = sphi %s3471_s24, %s4484_s24   ;;  %s3331_s23 = sphi %s3469_s23, %s4489_s23   ;;  %s3327_s22 = sphi %s3467_s22, %s4488_s22   ;;  %s3323_s21 = sphi %s3465_s21, %s4487_s21   ;;  %s3319_s20 = sphi %s3463_s20, %s4482_s20   ;;  %s3315_s19 = sphi %s3461_s19, %s4481_s19   ;;  %s3311_s18 = sphi %s3459_s18, %s4480_s18  }
  0x26   : > { %4375 = sst [smem:[#allocation40_spill]] %s3315_s19  ;;  %p2170_p0 = scmp.ge.s32.totalorder %s3351_s28, 1 }
  0x27   : > { %4376 = sst [smem:[#allocation41_spill]] %s3319_s20  ;;  %p4304_p1 = scmp.eq.s32.totalorder %s3515_s29, 0 }
  0x28   : > { %4377 = sst [smem:[#allocation42_spill]] %s3323_s21  ;;  %p440_p2 = scmp.lt.s32.totalorder %s3351_s28, 5 }
  0x29   : > { %4378 = sst [smem:[#allocation43_spill]] %s3335_s24  ;;  %s3353_s16 = smov [#allocation11]  }
  0x2a   : > { %4379 = sst [smem:[#allocation44_spill]] %s3339_s25  ;;  %p3520_p3 = pnand %p2170_p0, %p440_p2 }
  0x2b   : > { %4380 = sst [smem:[#allocation45_spill]] %s3343_s26  ;;  %s452_s17 = sshll.u32 %s3353_s16, 4  ;;  %s3524_s17 = int_to_ptr.vmem [resolvable:$true] %s452_s17 }
  0x2c   : > { %4381 = sst [smem:[#allocation46_spill]] %s3351_s28  ;;  %p2564_p4 = pneg %p3520_p3 }
  0x2d   : > { %4382 = sst [smem:[#allocation47_spill]] %s3515_s29  ;;  %s3354_s15 = smov [#allocation14]  }
  0x2e   : > { %s4383_s30 = scalar_select %p3520_p3, 1, 0 }
  0x2f   : > { %p3530_p5 = pnand %p2564_p4, %p4304_p1  ;;  %s476_s25 = sshll.u32 %s3354_s15, 4  ;;  %s3534_s25 = int_to_ptr.vmem [resolvable:$true] %s476_s25 }
  0x30   : > { %4384 = sst [smem:[#allocation48_spill]] %s4383_s30  ;;  %s3355_s24 = smov [#allocation17]  }
  0x31   : > { %s4385_s14 = scalar_select %p3530_p5, 1, 0 }
  0x32   : > { %s3536_s4 = sshll.u32 %s3355_s24, 4  ;;  %s4386_s5 = sld [smem:[#allocation64_spill]]  ;;  %s501_s4 = int_to_ptr.vmem [resolvable:$true] %s3536_s4 }
  0x33   : > { %p3546_p7 = pneg %p3530_p5 }
  0x35   : > { %s4387_s12 = scalar_select %p3546_p7, 1, 0 }
  0x38   : > { %s2763_s16 = scalar_lea.hbm %s4386_s5, 512 }
  0x39   : > { %p2764_p6 = scmp.ne.s32.totalorder %s4386_s5, %s2763_s16  ;;  %p2770_p10 = scmp.lt.u32.totalorder %s2763_s16, %s4386_s5 }
  0x3b   : > { %p2766_p8 = pnand %p3546_p7, %p2764_p6 }
  0x3d   : > { %p2767_p9 = pneg %p2766_p8 }
  0x3f   : > { %p2772_p11 = pnand %p2770_p10, %p2767_p9 }
  0x41   : > { %2775 = shalt.err (!%p2772_p11)
}
  0x42   : > { %s2776_s0 = scalar_lea.vmem %s3524_s17, 512  ;;  %p2784_p2 = scmp.lt.s32.totalorder %s3524_s17, %s3524_s17 }
  0x43   : > { %p2777_p12 = scmp.ne.s32.totalorder %s3524_s17, %s2776_s0  ;;  %p2785_p4 = scmp.lt.s32.totalorder %s2776_s0, %s2776_s0 }
  0x45   : > { %p2779_p13 = pnand %p2777_p12, %p3546_p7  ;;  %p2786_p6 = por %p2785_p4, %p2784_p2 }
  0x47   : > { %p2780_p0 = pneg %p2779_p13 }
  0x49   : > { %p2787_p8 = pnand %p2786_p6, %p2780_p0 }
  0x4b   : > { %2790 = shalt.err (!%p2787_p8)
}
  0x4c   : > { %s4306_s2 = smov 128   ;;  %s4308_s13 = smov 8  }
  0x4d   : > { %2567 = dma.hbm_to_vmem [thread:$0]  (!%p3530_p5), %s4386_s5, 512, %s3524_s17, [#allocation12], %s4306_s2, %s4306_s2, %s4308_s13  }
  0x4e   : > { %s4388_s7 = sld [smem:[#allocation66_spill]] }
  0x54   : > { %s2791_s0 = scalar_lea.hbm %s4388_s7, 2048 }
  0x55   : > { %p2792_p9 = scmp.ne.s32.totalorder %s4388_s7, %s2791_s0  ;;  %p2798_p12 = scmp.lt.u32.totalorder %s2791_s0, %s4388_s7 }
  0x57   : > { %p2794_p10 = pnand %p2792_p9, %p3546_p7 }
  0x59   : > { %p2795_p11 = pneg %p2794_p10 }
  0x5b   : > { %p2800_p13 = pnand %p2798_p12, %p2795_p11 }
  0x5d   : > { %2803 = shalt.err (!%p2800_p13)
}
  0x5e   : > { %s2804_s17 = scalar_lea.vmem %s3534_s25, 2048  ;;  %p2812_p6 = scmp.lt.s32.totalorder %s3534_s25, %s3534_s25 }
  0x5f   : > { %p2805_p0 = scmp.ne.s32.totalorder %s3534_s25, %s2804_s17  ;;  %p2813_p8 = scmp.lt.s32.totalorder %s2804_s17, %s2804_s17 }
  0x61   : > { %p2807_p2 = pnand %p2805_p0, %p3546_p7  ;;  %p2814_p9 = por %p2813_p8, %p2812_p6 }
  0x63   : > { %p2808_p4 = pneg %p2807_p2 }
  0x65   : > { %p2815_p10 = pnand %p2814_p9, %p2808_p4 }
  0x67   : > { %2818 = shalt.err (!%p2815_p10)
}
  0x68   : > { %2573 = dma.hbm_to_vmem [thread:$0]  (!%p3530_p5), %s4388_s7, 2048, %s3534_s25, [#allocation15], %s4306_s2, %s4306_s2, %s4308_s13  }
  0x69   : > { %s4389_s9 = sld [smem:[#allocation68_spill]] }
  0x6f   : > { %s2819_s30 = scalar_lea.hbm %s4389_s9, 1024 }
  0x70   : > { %p2820_p11 = scmp.ne.s32.totalorder %s4389_s9, %s2819_s30  ;;  %p2826_p0 = scmp.lt.u32.totalorder %s2819_s30, %s4389_s9 }
  0x72   : > { %p2822_p12 = pnand %p2820_p11, %p3546_p7 }
  0x74   : > { %p2823_p13 = pneg %p2822_p12 }
  0x76   : > { %p2828_p2 = pnand %p2826_p0, %p2823_p13 }
  0x78   : > { %2831 = shalt.err (!%p2828_p2)
}
  0x79   : > { %s2832_s17 = scalar_lea.vmem %s501_s4, 1024  ;;  %p2840_p9 = scmp.lt.s32.totalorder %s501_s4, %s501_s4 }
  0x7a   : > { %p2833_p4 = scmp.ne.s32.totalorder %s501_s4, %s2832_s17  ;;  %p2841_p10 = scmp.lt.s32.totalorder %s2832_s17, %s2832_s17 }
  0x7c   : > { %p2835_p6 = pnand %p2833_p4, %p3546_p7  ;;  %p2842_p1 = por %p2841_p10, %p2840_p9 }
  0x7e   : > { %p2836_p8 = pneg %p2835_p6 }
  0x80   : > { %p2843_p3 = pnand %p2842_p1, %p2836_p8 }
  0x82   : > { %2846 = shalt.err (!%p2843_p3)
}
  0x83   : > { %s4310_s25 = smov 256   ;;  %s4311_s3 = smov 16  }
  0x84   : > { %2579 = dma.hbm_to_vmem [thread:$0]  (!%p3530_p5), %s4389_s9, 1024, %s501_s4, [#allocation18], %s4310_s25, %s4310_s25, %s4311_s3  }
  0x85   : > { %s3360_s10 = smov [#allocation20]   ;;  %s4390_s11 = sld [smem:[#allocation70_spill]] }
  0x86   : > { %s527_s30 = sshll.u32 %s3360_s10, 4  ;;  %s528_s30 = int_to_ptr.vmem [resolvable:$true] %s527_s30 }
  0x8b   : > { %s2847_s24 = scalar_lea.hbm %s4390_s11, 32 }
  0x8c   : > { %p2848_p1 = scmp.ne.s32.totalorder %s4390_s11, %s2847_s24  ;;  %p2854_p12 = scmp.lt.u32.totalorder %s2847_s24, %s4390_s11 }
  0x8e   : > { %p2850_p3 = pnand %p2848_p1, %p3546_p7 }
  0x90   : > { %p2851_p11 = pneg %p2850_p3 }
  0x92   : > { %p2856_p13 = pnand %p2854_p12, %p2851_p11 }
  0x94   : > { %2859 = shalt.err (!%p2856_p13)
}
  0x95   : > { %s2860_s4 = scalar_lea.vmem %s528_s30, 32  ;;  %p2868_p6 = scmp.lt.s32.totalorder %s528_s30, %s528_s30 }
  0x96   : > { %p2861_p0 = scmp.ne.s32.totalorder %s528_s30, %s2860_s4  ;;  %p2869_p8 = scmp.lt.s32.totalorder %s2860_s4, %s2860_s4 }
  0x98   : > { %p2863_p2 = pnand %p2861_p0, %p3546_p7  ;;  %p2870_p9 = por %p2869_p8, %p2868_p6 }
  0x9a   : > { %p2864_p4 = pneg %p2863_p2 }
  0x9c   : > { %p2871_p10 = pnand %p2870_p9, %p2864_p4 }
  0x9e   : > { %2874 = shalt.err (!%p2871_p10)
}
  0x9f   : > { %2585 = dma.hbm_to_vmem [thread:$0]  (!%p3530_p5), %s4390_s11, 32, %s528_s30, [#allocation21]  }
  0xa0   : > { %s2169_s2 = sadd.s32 4294967294, %s3351_s28   ;;  %s55_s13 = sadd.s32 1, %s3343_s26 }
  0xa1   : > { %p56_p1 = scmp.ge.s32.totalorder %s55_s13, 2  ;;  %s58_s10 = sadd.s32 1, %s3347_s27 }
  0xa2   : > { %s67_s16 = sadd.s32 1, %s3331_s23  ;;  %p74_p3 = scmp.ne.s32.totalorder %s3331_s23, %s3327_s22 }
  0xa3   : > { %s4493_s13 = smov (%p56_p1, %s55_s13), 0  ;;  %s4495_s10 = smov (!%p56_p1, %s58_s10), %s3347_s27 }
  0xa4   : > { %4391 = sst [smem:[#allocation49_spill]] %s4493_s13  ;;  %s63_s15 = ssub.s32 %s3343_s26, %s4493_s13 }
  0xa5   : > { %p4319_p11 = scmp.eq.s32.totalorder %s3351_s28, 0  ;;  %p60_p12 = scmp.ge.s32.totalorder %s4495_s10, 2 }
  0xa6   : > { %p80_p13 = scmp.ne.s32.totalorder %s3327_s22, %s3323_s21  ;;  %p4318_p2 = scmp.eq.s32.totalorder %s3515_s29, 3 }
  0xa7   : > { %p3652_p0 = por %p4319_p11, %p74_p3  ;;  %s4497_s10 = smov (%p60_p12, %s4495_s10), 0 }
  0xa8   : > { %4393 = sst [smem:[#allocation50_spill]] %s4497_s10  ;;  %p4394_p4 = scmp.eq.s32.totalorder %s3515_s29, 0 }
  0xa9   : > { %p3667_p8 = por %p4318_p2, %p74_p3  ;;  %s3673_s17 = ssub.s32 %s3347_s27, %s4497_s10 }
  0xaa   : > { %p3661_p6 = por %p4394_p4, %p80_p13  ;;  %p3675_p9 = scmp.eq.s32.totalorder %s2169_s2, 3 }
  0xab   : > { %s4397_s0 = scalar_select %p3667_p8, 1, 0 }
  0xac   : > { %s4395_s24 = scalar_select %p3661_p6, 1, 0 }
  0xad   : > { %4398 = sst [smem:[#allocation52_spill]] %s4397_s0  ;;  %s64_s6 = sor.u32 %s63_s15, %s3673_s17 }
  0xae   : > { %4396 = sst [smem:[#allocation51_spill]] %s4395_s24  ;;  %p65_p1 = scmp.eq.s32.totalorder %s64_s6, 0 }
  0xaf   : > { %p3683_p12 = por %p3675_p9, %p80_p13  ;;  %p4315_p3 = scmp.lt.s32.totalorder %s3351_s28, 4 }
  0xb0   : > { %s4312_s25 = sand.u32 1, %s3331_s23   ;;  %s2182_s2 = sshll.u32 %s3347_s27, 1 }
  0xb1   : > { %s4400_s8 = scalar_select %p3683_p12, 1, 0 }
  0xb2   : > { %s3690_s3 = scalar_select %p65_p1, %s3331_s23, %s67_s16  }
  0xb3   : > { %4401 = sst [smem:[#allocation53_spill]] %s4400_s8  ;;  %s3694_s5 = sshll.u32 %s4312_s25, 3 }
  0xb4   : > { %4402 = sst [smem:[#allocation54_spill]] %s3690_s3  ;;  %s3698_s7 = sadd.s32 %s3343_s26, %s2182_s2 }
  0xb5   : > { %p3704_p4 = pnand %p4315_p3, %p3652_p0  ;;  %s4316_s6 = sshll.u32 %s3698_s7, 7 }
  0xb6   : > { %s4326_s16 = sand.u32 1, %s3351_s28   ;;  %s4404_s1 = sld [smem:[#allocation60_spill]] }
  0xb7   : > { %s4403_s15 = scalar_select %p3704_p4, 1, 0 }
  0xb8   : > { %s586_s30 = scalar_lea.vmem [#allocation5], %s3694_s5  ;;  %s3722_s10 = scalar_lea.sflag [#allocation6], %s4326_s16 }
  0xb9   : > { %s595_s2 = sshll.u32 %s586_s30, 4  ;;  %p4331_p0 = pneg %p3704_p4  ;;  %s3718_s2 = int_to_ptr.vmem [resolvable:$true] %s595_s2 }
  0xbc   : > { %s3715_s11 = scalar_lea.hbm %s4404_s1, %s4316_s6  ;;  %s2880_s6 = scalar_lea.hbm %s4404_s1, 512 }
  0xbd   : > { %s2875_s13 = scalar_lea.hbm %s3715_s11, 128  ;;  %p2881_p2 = scmp.lt.u32.totalorder %s3715_s11, %s4404_s1 }
  0xbe   : > { %p2876_p13 = scmp.ne.s32.totalorder %s3715_s11, %s2875_s13  ;;  %p2882_p11 = scmp.lt.u32.totalorder %s2880_s6, %s2875_s13 }
  0xbf   : > { %p2884_p12 = scmp.lt.u32.totalorder %s2875_s13, %s3715_s11 }
  0xc0   : > { %p2878_p1 = pnand %p4331_p0, %p2876_p13  ;;  %p2883_p10 = por %p2882_p11, %p2881_p2 }
  0xc2   : > { %p2879_p3 = pneg %p2878_p1  ;;  %p2885_p8 = por %p2884_p12, %p2883_p10 }
  0xc4   : > { %p2886_p6 = pnand %p2885_p8, %p2879_p3 }
  0xc6   : > { %2889 = shalt.err (!%p2886_p6)
}
  0xc7   : > { %s2890_s30 = scalar_lea.vmem %s3718_s2, 128  ;;  %s3361_s9 = smov [#allocation5]  }
  0xc8   : > { %p2891_p13 = scmp.ne.s32.totalorder %s3718_s2, %s2890_s30  ;;  %s2895_s25 = sshll.u32 %s3361_s9, 4  ;;  %s2896_s25 = int_to_ptr.vmem [resolvable:$false] %s2895_s25 }
  0xc9   : > { %s2897_s26 = scalar_lea.vmem %s2896_s25, 256  ;;  %p2898_p7 = scmp.lt.s32.totalorder %s3718_s2, %s2896_s25 }
  0xca   : > { %p2893_p1 = pnand %p2891_p13, %p4331_p0  ;;  %p2899_p11 = scmp.lt.s32.totalorder %s2897_s26, %s2890_s30 }
  0xcc   : > { %p2894_p5 = pneg %p2893_p1  ;;  %p2900_p2 = por %p2899_p11, %p2898_p7 }
  0xce   : > { %p2901_p10 = pnand %p2900_p2, %p2894_p5 }
  0xd0   : > { %2904 = shalt.err (!%p2901_p10)
}
  0xd1   : > { %2598 = dma.hbm_to_vmem [thread:$0]  (!%p3704_p4), %s3715_s11, 128, %s3718_s2, %s3722_s10  }
  0xd2   : > { %s121_s3 = sadd.s32 1, %s3319_s20  ;;  %p128_p5 = scmp.ne.s32.totalorder %s3319_s20, %s3315_s19 }
  0xd3   : > { %p4405_p7 = scmp.eq.s32.totalorder %s3673_s17, 0  ;;  %p4407_p6 = scmp.eq.s32.totalorder %s3351_s28, 0 }
  0xd4   : > { %p134_p12 = scmp.ne.s32.totalorder %s3315_s19, %s3311_s18  ;;  %p4408_p3 = scmp.eq.s32.totalorder %s3515_s29, 3 }
  0xd5   : > { %s3756_s13 = scalar_select %p4405_p7, %s3319_s20, %s121_s3  }
  0xd6   : > { %p130_p8 = por %p128_p5, %p4407_p6  ;;  %p3764_p13 = por %p4408_p3, %p128_p5 }
  0xd7   : > { %4406 = sst [smem:[#allocation55_spill]] %s3756_s13  ;;  %s3769_s30 = sand.u32 1, %s3319_s20  }
  0xd8   : > { %s4409_s6 = scalar_select %p3764_p13, 1, 0 }
  0xd9   : > { %p4411_p1 = scmp.eq.s32.totalorder %s3515_s29, 0  ;;  %p3779_p2 = por %p3675_p9, %p134_p12 }
  0xda   : > { %4410 = sst [smem:[#allocation56_spill]] %s4409_s6  ;;  %p4416_p10 = scmp.lt.s32.totalorder %s3351_s28, 4 }
  0xdb   : > { %p3773_p11 = por %p134_p12, %p4411_p1  ;;  %s2189_s9 = sshll.u32 %s3347_s27, 4 }
  0xdc   : > { %s4414_s17 = scalar_select %p3779_p2, 1, 0 }
  0xdd   : > { %s4412_s11 = scalar_select %p3773_p11, 1, 0 }
  0xde   : > { %4415 = sst [smem:[#allocation58_spill]] %s4414_s17  ;;  %p3785_p7 = pnand %p4416_p10, %p130_p8 }
  0xdf   : > { %4413 = sst [smem:[#allocation57_spill]] %s4412_s11  ;;  %s4418_s3 = sld [smem:[#allocation62_spill]] }
  0xe0   : > { %s4417_s2 = scalar_select %p3785_p7, 1, 0 }
  0xe1   : > { %s623_s4 = scalar_lea.vmem [#allocation8], %s3769_s30  ;;  %s4419_s20 = sand.u32 1, %s3351_s28  }
  0xe2   : > { %s630_s1 = sshll.u32 %s623_s4, 4  ;;  %s3801_s17 = scalar_lea.sflag [#allocation9], %s4419_s20  ;;  %s3797_s1 = int_to_ptr.vmem [resolvable:$true] %s630_s1 }
  0xe3   : > { %p3807_p5 = pneg %p3785_p7 }
  0xe5   : > { %s3793_s16 = scalar_lea.hbm %s4418_s3, %s2189_s9  ;;  %s2910_s26 = scalar_lea.hbm %s4418_s3, 32 }
  0xe6   : > { %s2905_s18 = scalar_lea.hbm %s3793_s16, 16  ;;  %p2911_p12 = scmp.lt.u32.totalorder %s3793_s16, %s4418_s3 }
  0xe7   : > { %p2906_p9 = scmp.ne.s32.totalorder %s3793_s16, %s2905_s18  ;;  %p2912_p3 = scmp.lt.u32.totalorder %s2910_s26, %s2905_s18 }
  0xe8   : > { %s4420_s8 = scalar_select %p3807_p5, 1, 0 }
  0xe9   : > { %p2908_p6 = pnand %p3807_p5, %p2906_p9  ;;  %p2913_p1 = por %p2912_p3, %p2911_p12 }
  0xea   : > { %p2914_p10 = scmp.lt.u32.totalorder %s2905_s18, %s3793_s16 }
  0xeb   : > { %p2909_p8 = pneg %p2908_p6 }
  0xec   : > { %p2915_p0 = por %p2914_p10, %p2913_p1 }
  0xee   : > { %p2916_p2 = pnand %p2915_p0, %p2909_p8 }
  0xf0   : > { %2919 = shalt.err (!%p2916_p2)
}
  0xf1   : > { %s2920_s20 = scalar_lea.vmem %s3797_s1, 16  ;;  %s3362_s9 = smov [#allocation8]  }
  0xf2   : > { %p2921_p9 = scmp.ne.s32.totalorder %s3797_s1, %s2920_s20  ;;  %s2925_s25 = sshll.u32 %s3362_s9, 4  ;;  %s2926_s25 = int_to_ptr.vmem [resolvable:$false] %s2925_s25 }
  0xf3   : > { %s2927_s13 = scalar_lea.vmem %s2926_s25, 32  ;;  %p2928_p11 = scmp.lt.s32.totalorder %s3797_s1, %s2926_s25 }
  0xf4   : > { %p2923_p6 = pnand %p2921_p9, %p3807_p5  ;;  %p2929_p4 = scmp.lt.s32.totalorder %s2927_s13, %s2920_s20 }
  0xf6   : > { %p2924_p13 = pneg %p2923_p6  ;;  %p2930_p12 = por %p2929_p4, %p2928_p11 }
  0xf8   : > { %p2931_p3 = pnand %p2930_p12, %p2924_p13 }
  0xfa   : > { %2934 = shalt.err (!%p2931_p3)
}
  0xfb   : > { %2604 = dma.hbm_to_vmem [thread:$0]  (!%p3785_p7), %s3793_s16, 16, %s3797_s1, %s3801_s17  }
  0xfc   : > { %s4421_s18 = sshll.u32 %s3769_s30, 4  ;;  %s3363_s9 = smov [#allocation13]  }
  0xfd   : > { %s641_s26 = scalar_lea.vmem [#allocation10], %s4421_s18  ;;  %s466_s3 = sshll.u32 %s3363_s9, 4  ;;  %s467_s3 = int_to_ptr.vmem [resolvable:$true] %s466_s3 }
  0xfe   : > { %s648_s4 = sshll.u32 %s641_s26, 4  ;;  %s4422_s13 = sld [smem:[#allocation65_spill]]  ;;  %s3833_s4 = int_to_ptr.vmem [resolvable:$true] %s648_s4 }
  0xff   : > { %p4423_p0 = scmp.ne.s32.totalorder %s4387_s12, 0 }
 0x104   : > { %s2935_s21 = scalar_lea.hbm %s4422_s13, 16 }
 0x105   : > { %p2936_p4 = scmp.ne.s32.totalorder %s4422_s13, %s2935_s21  ;;  %p2942_p2 = scmp.lt.u32.totalorder %s2935_s21, %s4422_s13 }
 0x107   : > { %p2938_p13 = pnand %p2936_p4, %p4423_p0 }
 0x109   : > { %p2939_p11 = pneg %p2938_p13 }
 0x10b   : > { %p2944_p8 = pnand %p2942_p2, %p2939_p11 }
 0x10d   : > { %2947 = shalt.err (!%p2944_p8)
}
 0x10e   : > { %s2948_s18 = scalar_lea.vmem %s467_s3, 16  ;;  %s2955_s26 = scalar_lea.vmem %s467_s3, 32 }
 0x10f   : > { %p2949_p1 = scmp.ne.s32.totalorder %s467_s3, %s2948_s18  ;;  %p2956_p6 = scmp.lt.s32.totalorder %s467_s3, %s467_s3 }
 0x110   : > { %p2957_p12 = scmp.lt.s32.totalorder %s2955_s26, %s2948_s18 }
 0x111   : > { %p2951_p10 = pnand %p2949_p1, %p4423_p0 }
 0x112   : > { %p2958_p3 = por %p2957_p12, %p2956_p6 }
 0x113   : > { %p2952_p9 = pneg %p2951_p10 }
 0x115   : > { %p2959_p7 = pnand %p2958_p3, %p2952_p9 }
 0x117   : > { %2962 = shalt.err (!%p2959_p7)
}
 0x118   : > { %p4424_p4 = scmp.ne.s32.totalorder %s4385_s14, 0  ;;  %s3364_s21 = smov [#allocation16]  }
 0x119   : > { %s490_s9 = sshll.u32 %s3364_s21, 4  ;;  %s3365_s20 = smov [#allocation19]   ;;  %s491_s9 = int_to_ptr.vmem [resolvable:$true] %s490_s9 }
 0x11a   : > { %2570 = dma.hbm_to_vmem [thread:$0]  (!%p4424_p4), %s4422_s13, 16, %s467_s3, [#allocation12]  }
 0x11b   : > { %s513_s25 = sshll.u32 %s3365_s20, 4  ;;  %s4425_s6 = sld [smem:[#allocation67_spill]]  ;;  %s514_s25 = int_to_ptr.vmem [resolvable:$true] %s513_s25 }
 0x121   : > { %s2963_s11 = scalar_lea.hbm %s4425_s6, 16 }
 0x122   : > { %p2964_p7 = scmp.ne.s32.totalorder %s4425_s6, %s2963_s11  ;;  %p2970_p2 = scmp.lt.u32.totalorder %s2963_s11, %s4425_s6 }
 0x124   : > { %p2966_p13 = pnand %p2964_p7, %p4423_p0 }
 0x126   : > { %p2967_p11 = pneg %p2966_p13 }
 0x128   : > { %p2972_p8 = pnand %p2970_p2, %p2967_p11 }
 0x12a   : > { %2975 = shalt.err (!%p2972_p8)
}
 0x12b   : > { %s2976_s3 = scalar_lea.vmem %s491_s9, 16  ;;  %s2983_s0 = scalar_lea.vmem %s491_s9, 32 }
 0x12c   : > { %p2977_p1 = scmp.ne.s32.totalorder %s491_s9, %s2976_s3  ;;  %p2984_p6 = scmp.lt.s32.totalorder %s491_s9, %s491_s9 }
 0x12d   : > { %p2985_p12 = scmp.lt.s32.totalorder %s2983_s0, %s2976_s3 }
 0x12e   : > { %p2979_p10 = pnand %p2977_p1, %p4423_p0 }
 0x12f   : > { %p2986_p3 = por %p2985_p12, %p2984_p6 }
 0x130   : > { %p2980_p9 = pneg %p2979_p10 }
 0x132   : > { %p2987_p5 = pnand %p2986_p3, %p2980_p9 }
 0x134   : > { %2990 = shalt.err (!%p2987_p5)
}
 0x135   : > { %2576 = dma.hbm_to_vmem [thread:$0]  (!%p4424_p4), %s4425_s6, 16, %s491_s9, [#allocation15]  }
 0x136   : > { %s4426_s1 = sld [smem:[#allocation69_spill]] }
 0x13c   : > { %s2991_s16 = scalar_lea.hbm %s4426_s1, 4096 }
 0x13d   : > { %p2992_p7 = scmp.ne.s32.totalorder %s4426_s1, %s2991_s16  ;;  %p2998_p5 = scmp.lt.u32.totalorder %s2991_s16, %s4426_s1 }
 0x13f   : > { %p2994_p13 = pnand %p2992_p7, %p4423_p0 }
 0x141   : > { %p2995_p11 = pneg %p2994_p13 }
 0x143   : > { %p3000_p2 = pnand %p2998_p5, %p2995_p11 }
 0x145   : > { %3003 = shalt.err (!%p3000_p2)
}
 0x146   : > { %s3004_s0 = scalar_lea.vmem %s514_s25, 4096  ;;  %p3012_p9 = scmp.lt.s32.totalorder %s514_s25, %s514_s25 }
 0x147   : > { %p3005_p8 = scmp.ne.s32.totalorder %s514_s25, %s3004_s0  ;;  %p3013_p6 = scmp.lt.s32.totalorder %s3004_s0, %s3004_s0 }
 0x149   : > { %p3007_p1 = pnand %p3005_p8, %p4423_p0  ;;  %p3014_p12 = por %p3013_p6, %p3012_p9 }
 0x14b   : > { %p3008_p10 = pneg %p3007_p1 }
 0x14d   : > { %p3015_p3 = pnand %p3014_p12, %p3008_p10 }
 0x14f   : > { %3018 = shalt.err (!%p3015_p3)
}
 0x150   : > { %s4427_s9 = smov 16   ;;  %s4428_s21 = smov 256  }
 0x151   : > { %2582 = dma.hbm_to_vmem [thread:$0]  (!%p4424_p4), %s4426_s1, 4096, %s514_s25, [#allocation18], %s4428_s21, %s4428_s21, %s4427_s9  }
 0x152   : > { %s3366_s11 = smov [#allocation22]   ;;  %s3367_s18 = smov [#allocation23]  }
 0x153   : > { %s537_s16 = sshll.u32 %s3366_s11, 4  ;;  %s551_s26 = sshll.u32 %s3367_s18, 4  ;;  %s538_s16 = int_to_ptr.vmem [resolvable:$true] %s537_s16  ;;  %s552_s26 = int_to_ptr.vmem [resolvable:$true] %s551_s26 }
 0x154   : > { %s4429_s0 = sld [smem:[#allocation71_spill]] }
 0x15a   : > { %s3019_s6 = scalar_lea.hbm %s4429_s0, 4096 }
 0x15b   : > { %p3020_p7 = scmp.ne.s32.totalorder %s4429_s0, %s3019_s6  ;;  %p3026_p5 = scmp.lt.u32.totalorder %s3019_s6, %s4429_s0 }
 0x15d   : > { %p3022_p13 = pnand %p3020_p7, %p4423_p0 }
 0x15f   : > { %p3023_p11 = pneg %p3022_p13 }
 0x161   : > { %p3028_p2 = pnand %p3026_p5, %p3023_p11 }
 0x163   : > { %3031 = shalt.err (!%p3028_p2)
}
 0x164   : > { %s3032_s25 = scalar_lea.vmem %s538_s16, 4096  ;;  %p3040_p9 = scmp.lt.s32.totalorder %s538_s16, %s538_s16 }
 0x165   : > { %p3033_p8 = scmp.ne.s32.totalorder %s538_s16, %s3032_s25  ;;  %p3041_p6 = scmp.lt.s32.totalorder %s3032_s25, %s3032_s25 }
 0x167   : > { %p3035_p1 = pnand %p3033_p8, %p4423_p0  ;;  %p3042_p12 = por %p3041_p6, %p3040_p9 }
 0x169   : > { %p3036_p10 = pneg %p3035_p1 }
 0x16b   : > { %p3043_p3 = pnand %p3042_p12, %p3036_p10 }
 0x16d   : > { %3046 = shalt.err (!%p3043_p3)
}
 0x16e   : > { %s4430_s29 = smov 8   ;;  %s4431_s13 = smov 128  }
 0x16f   : > { %2588 = dma.hbm_to_vmem [thread:$0]  (!%p4424_p4), %s4429_s0, 4096, %s538_s16, [#allocation21], %s4431_s13, %s4431_s13, %s4430_s29  }
 0x170   : > { %s4432_s19 = sld [smem:[#allocation72_spill]] }
 0x176   : > { %s4433_s11 = smov %s4432_s19  ;;  %s3047_s18 = scalar_lea.hbm %s4432_s19, 16 }
 0x177   : > { %p3048_p7 = scmp.ne.s32.totalorder %s4433_s11, %s3047_s18  ;;  %p3054_p5 = scmp.lt.u32.totalorder %s3047_s18, %s4433_s11 }
 0x179   : > { %p3050_p13 = pnand %p3048_p7, %p4423_p0 }
 0x17b   : > { %p3051_p11 = pneg %p3050_p13 }
 0x17d   : > { %p3056_p2 = pnand %p3054_p5, %p3051_p11 }
 0x17f   : > { %3059 = shalt.err (!%p3056_p2)
}
 0x180   : > { %s3060_s24 = scalar_lea.vmem %s552_s26, 16  ;;  %s3067_s16 = scalar_lea.vmem %s552_s26, 32 }
 0x181   : > { %p3061_p8 = scmp.ne.s32.totalorder %s552_s26, %s3060_s24  ;;  %p3068_p9 = scmp.lt.s32.totalorder %s552_s26, %s552_s26 }
 0x182   : > { %p3069_p6 = scmp.lt.s32.totalorder %s3067_s16, %s3060_s24 }
 0x183   : > { %p3063_p1 = pnand %p3061_p8, %p4423_p0 }
 0x184   : > { %p3070_p12 = por %p3069_p6, %p3068_p9 }
 0x185   : > { %p3064_p10 = pneg %p3063_p1 }
 0x187   : > { %p3071_p3 = pnand %p3070_p12, %p3064_p10 }
 0x189   : > { %3074 = shalt.err (!%p3071_p3)
}
 0x18a   : > { %2591 = dma.hbm_to_vmem [thread:$0]  (!%p4424_p4), %s4433_s11, 16, %s552_s26, [#allocation24]  }
 0x18b   : > { %s4434_s12 = sshll.u32 %s3698_s7, 7  ;;  %s4435_s18 = sld [smem:[#allocation59_spill]] }
 0x18c   : > { %s566_s14 = scalar_lea.vmem [#allocation2], %s3694_s5  ;;  %s2187_s25 = sshll.u32 %s3769_s30, 2 }
 0x18d   : > { %s575_s20 = sshll.u32 %s566_s14, 4  ;;  %s4437_s24 = sand.u32 1, %s3331_s23   ;;  %s576_s20 = int_to_ptr.vmem [resolvable:$true] %s575_s20 }
 0x18e   : > { %s563_s16 = scalar_lea.sflag [#allocation3], %s4437_s24  ;;  %p4438_p7 = scmp.ne.s32.totalorder %s4403_s15, 0 }
 0x190   : > { %p4439_p4 = pneg %p4438_p7 }
 0x191   : > { %s4436_s3 = smov %s4435_s18  ;;  %s3936_s28 = scalar_lea.hbm %s4435_s18, %s4434_s12 }
 0x192   : > { %s3075_s6 = scalar_lea.hbm %s3936_s28, 128  ;;  %s3080_s9 = scalar_lea.hbm %s4436_s3, 512 }
 0x193   : > { %p3076_p0 = scmp.ne.s32.totalorder %s3936_s28, %s3075_s6  ;;  %p3081_p5 = scmp.lt.u32.totalorder %s3936_s28, %s4436_s3 }
 0x194   : > { %p3082_p2 = scmp.lt.u32.totalorder %s3080_s9, %s3075_s6  ;;  %p3084_p1 = scmp.lt.u32.totalorder %s3075_s6, %s3936_s28 }
 0x195   : > { %p3078_p13 = pnand %p3076_p0, %p4439_p4 }
 0x196   : > { %p3083_p8 = por %p3082_p2, %p3081_p5 }
 0x197   : > { %p3079_p11 = pneg %p3078_p13 }
 0x198   : > { %p3085_p10 = por %p3084_p1, %p3083_p8 }
 0x19a   : > { %p3086_p9 = pnand %p3085_p10, %p3079_p11 }
 0x19c   : > { %3089 = shalt.err (!%p3086_p9)
}
 0x19d   : > { %s3090_s5 = scalar_lea.vmem %s576_s20, 128  ;;  %p4440_p12 = pmov %p4439_p4 }
 0x19e   : > { %p3091_p6 = scmp.ne.s32.totalorder %s576_s20, %s3090_s5  ;;  %s3368_s19 = smov [#allocation2]  }
 0x19f   : > { %s3095_s18 = sshll.u32 %s3368_s19, 4  ;;  %s3096_s18 = int_to_ptr.vmem [resolvable:$false] %s3095_s18 }
 0x1a0   : > { %p3093_p3 = pnand %p3091_p6, %p4440_p12  ;;  %s3097_s14 = scalar_lea.vmem %s3096_s18, 256 }
 0x1a1   : > { %p3098_p4 = scmp.lt.s32.totalorder %s576_s20, %s3096_s18  ;;  %p3099_p13 = scmp.lt.s32.totalorder %s3097_s14, %s3090_s5 }
 0x1a2   : > { %p3094_p0 = pneg %p3093_p3 }
 0x1a3   : > { %p3100_p2 = por %p3099_p13, %p3098_p4 }
 0x1a5   : > { %p3101_p5 = pnand %p3100_p2, %p3094_p0 }
 0x1a7   : > { %3104 = shalt.err (!%p3101_p5)
}
 0x1a8   : > { %2595 = dma.hbm_to_vmem [thread:$0]  (!%p4438_p7), %s3936_s28, 128, %s576_s20, %s563_s16  }
 0x1a9   : > { %s2188_s24 = sshll.u32 %s3347_s27, 6  ;;  %s606_s6 = scalar_lea.vmem [#allocation7], %s2187_s25 }
 0x1aa   : > { %s613_s7 = sshll.u32 %s606_s6, 4  ;;  %s4441_s12 = sld [smem:[#allocation61_spill]]  ;;  %s614_s7 = int_to_ptr.vmem [resolvable:$true] %s613_s7 }
 0x1ab   : > { %p4442_p8 = scmp.ne.s32.totalorder %s4420_s8, 0 }
 0x1b0   : > { %s611_s21 = scalar_lea.hbm %s4441_s12, %s2188_s24  ;;  %s3110_s18 = scalar_lea.hbm %s4441_s12, 128 }
 0x1b1   : > { %s3105_s5 = scalar_lea.hbm %s611_s21, 64  ;;  %p3111_p7 = scmp.lt.u32.totalorder %s611_s21, %s4441_s12 }
 0x1b2   : > { %p3106_p11 = scmp.ne.s32.totalorder %s611_s21, %s3105_s5  ;;  %p3112_p9 = scmp.lt.u32.totalorder %s3110_s18, %s3105_s5 }
 0x1b3   : > { %p3114_p12 = scmp.lt.u32.totalorder %s3105_s5, %s611_s21 }
 0x1b4   : > { %p3108_p1 = pnand %p3106_p11, %p4442_p8  ;;  %p3113_p6 = por %p3112_p9, %p3111_p7 }
 0x1b6   : > { %p3109_p10 = pneg %p3108_p1  ;;  %p3115_p3 = por %p3114_p12, %p3113_p6 }
 0x1b8   : > { %p3116_p0 = pnand %p3115_p3, %p3109_p10 }
 0x1ba   : > { %3119 = shalt.err (!%p3116_p0)
}
 0x1bb   : > { %s3120_s30 = scalar_lea.vmem %s614_s7, 64  ;;  %s3369_s20 = smov [#allocation7]  }
 0x1bc   : > { %p3121_p4 = scmp.ne.s32.totalorder %s614_s7, %s3120_s30  ;;  %s3125_s25 = sshll.u32 %s3369_s20, 4  ;;  %s3126_s25 = int_to_ptr.vmem [resolvable:$false] %s3125_s25 }
 0x1bd   : > { %s3127_s16 = scalar_lea.vmem %s3126_s25, 128  ;;  %p3128_p5 = scmp.lt.s32.totalorder %s614_s7, %s3126_s25 }
 0x1be   : > { %p3123_p13 = pnand %p3121_p4, %p4442_p8  ;;  %p3129_p11 = scmp.lt.s32.totalorder %s3127_s16, %s3120_s30 }
 0x1c0   : > { %p3124_p2 = pneg %p3123_p13  ;;  %p3130_p1 = por %p3129_p11, %p3128_p5 }
 0x1c2   : > { %p3131_p7 = pnand %p3130_p1, %p3124_p2 }
 0x1c4   : > { %3134 = shalt.err (!%p3131_p7)
}
 0x1c5   : > { %p4443_p9 = scmp.ne.s32.totalorder %s4417_s2, 0  ;;  %s2234_s24 = sshll.u32 %s3347_s27, 8 }
 0x1c6   : > { %s4444_s9 = sld [smem:[#allocation63_spill]] }
 0x1c7   : > { %2601 = dma.hbm_to_vmem [thread:$0]  (!%p4443_p9), %s611_s21, 64, %s614_s7, %s3722_s10  }
 0x1cc   : > { %s3984_s5 = scalar_lea.hbm %s4444_s9, %s2234_s24  ;;  %s3140_s14 = scalar_lea.hbm %s4444_s9, 512 }
 0x1cd   : > { %s3135_s15 = scalar_lea.hbm %s3984_s5, 256  ;;  %p3141_p3 = scmp.lt.u32.totalorder %s3984_s5, %s4444_s9 }
 0x1ce   : > { %p3136_p10 = scmp.ne.s32.totalorder %s3984_s5, %s3135_s15  ;;  %p3142_p0 = scmp.lt.u32.totalorder %s3140_s14, %s3135_s15 }
 0x1cf   : > { %p3144_p13 = scmp.lt.u32.totalorder %s3135_s15, %s3984_s5 }
 0x1d0   : > { %p3138_p6 = pnand %p3136_p10, %p4442_p8  ;;  %p3143_p4 = por %p3142_p0, %p3141_p3 }
 0x1d2   : > { %p3139_p12 = pneg %p3138_p6  ;;  %p3145_p2 = por %p3144_p13, %p3143_p4 }
 0x1d4   : > { %p3146_p5 = pnand %p3145_p2, %p3139_p12 }
 0x1d6   : > { %3149 = shalt.err (!%p3146_p5)
}
 0x1d7   : > { %s3150_s21 = scalar_lea.vmem %s3833_s4, 256  ;;  %s3370_s28 = smov [#allocation10]  }
 0x1d8   : > { %p3151_p11 = scmp.ne.s32.totalorder %s3833_s4, %s3150_s21  ;;  %s3155_s30 = sshll.u32 %s3370_s28, 4  ;;  %s3156_s30 = int_to_ptr.vmem [resolvable:$false] %s3155_s30 }
 0x1d9   : > { %s3157_s20 = scalar_lea.vmem %s3156_s30, 512  ;;  %p3158_p10 = scmp.lt.s32.totalorder %s3833_s4, %s3156_s30 }
 0x1da   : > { %p3153_p1 = pnand %p3151_p11, %p4442_p8  ;;  %p3159_p6 = scmp.lt.s32.totalorder %s3157_s20, %s3150_s21 }
 0x1dc   : > { %p3154_p7 = pneg %p3153_p1  ;;  %p3160_p3 = por %p3159_p6, %p3158_p10 }
 0x1de   : > { %p3161_p0 = pnand %p3160_p3, %p3154_p7 }
 0x1e0   : > { %3164 = shalt.err (!%p3161_p0)
}
 0x1e1   : > { %2607 = dma.hbm_to_vmem [thread:$0]  (!%p4443_p9), %s3984_s5, 256, %s3833_s4, %s3801_s17, %s4431_s13, %s4431_s13, %s4430_s29  }
 0x1e2   : > { %s4445_s8 = sld [smem:[#allocation48_spill]] }
 0x1e8   : > { %p4446_p8 = scmp.ne.s32.totalorder %s4445_s8, 0 }
 0x1e9   : > { %s4447_s25 = sld [smem:[#allocation51_spill]] (!%p4446_p8)  ;;  %s4014_s16 = sand.u32 (!%p4446_p8), 1, %s3327_s22  }
 0x1ea   : > { %660 = sbr.rel (%p4446_p8) target bundleno = 3536 (0xdd0), region = 76  ;;  %s4017_s24 = sshll.u32 (!%p4446_p8), %s4014_s16, 3 }
 0x1eb   : > { %s663_s2 = scalar_lea.sflag (!%p4446_p8), [#allocation3], %s4014_s16  ;;  %s666_s6 = scalar_lea.vmem (!%p4446_p8), [#allocation2], %s4017_s24 }
 0x1ef   : > { %p4448_p12 = scmp.ne.s32.totalorder (!%p4446_p8), %s4447_s25, 0 }
 0x1f1   : > { %3266 = dma.done.wait (%p4448_p12), %s663_s2, 128  }
 0x1f2   : > { %3268 = vsyncadd (%p4448_p12), %s663_s2, 4294967168  ;;  %s4449_s17 = sld [smem:[#allocation47_spill]]  ;;  %s675_s13 = scalar_lea.vmem [#allocation5], %s4017_s24 }
 0x1f8   : > { %s671_s4 = sand.u32 1, %s4449_s17  }
 0x1f9   : > { %s672_s29 = scalar_lea.sflag [#allocation6], %s671_s4 }
 0x1fa   : > { %3270 = dma.done.wait (%p4448_p12), %s672_s29, 128  }
 0x1fb   : > { %3272 = vsyncadd (%p4448_p12), %s672_s29, 4294967168  ;;  %s4450_s26 = sld [smem:[#allocation40_spill]]  ;;  %s4451_s5 = sld [smem:[#allocation57_spill]] }
 0x201   : > { %s4032_s15 = sand.u32 1, %s4450_s26   ;;  %p4452_p9 = scmp.ne.s32.totalorder %s4451_s5, 0 }
 0x202   : > { %s2196_s19 = sshll.u32 %s4032_s15, 2 }
 0x203   : > { %s4035_s18 = scalar_lea.vmem [#allocation7], %s2196_s19 }
 0x204   : > { %3274 = dma.done.wait (%p4452_p9), %s672_s29, 64  }
 0x205   : > { %3276 = vsyncadd (%p4452_p9), %s672_s29, 4294967232  ;;  %s690_s14 = scalar_lea.sflag [#allocation9], %s671_s4  ;;  %s692_s10 = scalar_lea.vmem [#allocation8], %s4032_s15 }
 0x206   : > { %3278 = dma.done.wait (%p4452_p9), %s690_s14, 272  }
 0x207   : > { %3280 = vsyncadd (%p4452_p9), %s690_s14, 4294967024  ;;  %s2197_s7 = sshll.u32 %s4032_s15, 4  ;;  %p4453_p4 = scmp.eq.s32.totalorder %s4449_s17, 0 }
 0x208   : > { %s701_s21 = scalar_lea.vmem [#allocation10], %s2197_s7 }
 0x209   : > { %3282 = dma.done.wait (%p4453_p4), [#allocation12], 528   ;;  %p4454_p13 = pmov %p4453_p4 }
 0x20a   : > { %p4455_p2 = pmov %p4453_p4 }
 0x20b   : > { %3284 = vsyncadd (%p4454_p13), [#allocation12], 4294966768 }
 0x20c   : > { %3286 = dma.done.wait (%p4455_p2), [#allocation15], 2064   ;;  %p4456_p5 = pmov %p4455_p2 }
 0x20d   : > { %p4457_p11 = pmov %p4455_p2 }
 0x20e   : > { %3288 = vsyncadd (%p4456_p5), [#allocation15], 4294965232 }
 0x20f   : > { %3290 = dma.done.wait (%p4457_p11), [#allocation18], 5120   ;;  %p4458_p1 = pmov %p4455_p2 }
 0x211   : > { %3292 = vsyncadd (%p4458_p1), [#allocation18], 4294962176  ;;  %p4459_p7 = pmov %p4458_p1 }
 0x212   : > { %p4460_p10 = pmov %p4458_p1 }
 0x213   : > { %3294 = dma.done.wait (%p4459_p7), [#allocation21], 4128  }
 0x214   : > { %3296 = vsyncadd (%p4460_p10), [#allocation21], 4294963168  ;;  %p4461_p6 = pmov %p4458_p1 }
 0x215   : > { %p4462_p3 = pmov %p4458_p1 }
 0x216   : > { %3298 = dma.done.wait (%p4461_p6), [#allocation24], 16  }
 0x217   : > { %3300 = vsyncadd (%p4462_p3), [#allocation24], 4294967280  ;;  %v4067_v0 = vld [vmem:[%s701_s21] sm:$0xff]  ;;  %v4069_v1 = vld [vmem:[%s701_s21 + $0x8] sm:$0xff]  ;;  %s800_s28 = scalar_lea.vmem [#allocation25], %s4017_s24  ;;  %s4072_s30 = scalar_lea.vmem [#allocation26], %s2197_s7 }
 0x218   : > { %s4463_s20 = sld [smem:[#allocation43_spill]] }
 0x21e   : > { %p2209_p0 = scmp.ne.s32.totalorder %s4463_s20, 0 }
 0x21f   : > { %v814_v2 = vld [vmem:[#allocation11] sm:$0xff] (!%p2209_p0)  ;;  %v815_v3 = vld [vmem:[#allocation11 + $0x8] sm:$0xff] (!%p2209_p0)  ;;  %v816_v4 = vld [vmem:[#allocation11 + $0x10] sm:$0xff] (!%p2209_p0)  ;;  %vm825_vm0 = vcmask (!%p2209_p0), 261120  }
 0x220   : > { %813 = sbr.rel (%p2209_p0) target bundleno = 988 (0x3dc), region = 136  ;;  %v2388_v5 = vpack.c.bf16 (!%p2209_p0), %v815_v3, %v814_v2  ;;  %v817_v6 = vld [vmem:[#allocation11 + $0x18] sm:$0xff] (!%p2209_p0)  ;;  %2317 = vmatprep.mubr.msk.f32.mxu0 (!%p2209_p0), %vm825_vm0, %v4067_v0  ;;  %v909_v7 = vld [vmem:[#allocation14] sm:$0xff] (!%p2209_p0)  ;;  %v910_v8 = vld [vmem:[#allocation14 + $0x8] sm:$0xff] (!%p2209_p0) }
 0x221   : > { %v2392_v9 = vpack.c.bf16 (!%p2209_p0), %v817_v6, %v816_v4  ;;  %v2396_v10 = vpack.c.bf16 (!%p2209_p0), %v910_v8, %v909_v7  ;;  %v911_v11 = vld [vmem:[#allocation14 + $0x10] sm:$0xff] (!%p2209_p0)  ;;  %v912_v12 = vld [vmem:[#allocation14 + $0x18] sm:$0xff] (!%p2209_p0)  ;;  %v913_v14 = vld [vmem:[#allocation14 + $0x20] sm:$0xff] (!%p2209_p0) }
 0x222   : > { %2389 = vmatprep.subr.bf16.mxu0 (!%p2209_p0), %v2388_v5  ;;  %v2400_v13 = vpack.c.bf16 (!%p2209_p0), %v912_v12, %v911_v11  ;;  %v914_v15 = vld [vmem:[#allocation14 + $0x28] sm:$0xff] (!%p2209_p0)  ;;  %v915_v17 = vld [vmem:[#allocation14 + $0x30] sm:$0xff] (!%p2209_p0)  ;;  %v916_v18 = vld [vmem:[#allocation14 + $0x38] sm:$0xff] (!%p2209_p0) }
 0x223   : > { %2391 = vmatpush3.bf16.msra.mxu0 (!%p2209_p0), %v2388_v5  ;;  %2397 = vmatprep.subr.bf16.mxu1 (!%p2209_p0), %v2396_v10  ;;  %v2404_v16 = vpack.c.bf16 (!%p2209_p0), %v914_v15, %v913_v14  ;;  %v2408_v19 = vpack.c.bf16 (!%p2209_p0), %v916_v18, %v915_v17  ;;  %v917_v20 = vld [vmem:[#allocation14 + $0x40] sm:$0xff] (!%p2209_p0)  ;;  %v918_v21 = vld [vmem:[#allocation14 + $0x48] sm:$0xff] (!%p2209_p0)  ;;  %v919_v23 = vld [vmem:[#allocation14 + $0x50] sm:$0xff] (!%p2209_p0) }
 0x224   : > { %2393 = vmatprep.subr.bf16.mxu0 (!%p2209_p0), %v2392_v9  ;;  %2399 = vmatpush3.bf16.msra.mxu1 (!%p2209_p0), %v2396_v10  ;;  %v2412_v22 = vpack.c.bf16 (!%p2209_p0), %v918_v21, %v917_v20  ;;  %v920_v24 = vld [vmem:[#allocation14 + $0x58] sm:$0xff] (!%p2209_p0)  ;;  %v921_v26 = vld [vmem:[#allocation14 + $0x60] sm:$0xff] (!%p2209_p0)  ;;  %v922_v27 = vld [vmem:[#allocation14 + $0x68] sm:$0xff] (!%p2209_p0) }
 0x225   : > { %2401 = vmatprep.subr.bf16.mxu1 (!%p2209_p0), %v2400_v13  ;;  %v2416_v25 = vpack.c.bf16 (!%p2209_p0), %v920_v24, %v919_v23  ;;  %v2420_v28 = vpack.c.bf16 (!%p2209_p0), %v922_v27, %v921_v26  ;;  %v923_v29 = vld [vmem:[#allocation14 + $0x70] sm:$0xff] (!%p2209_p0)  ;;  %v924_v30 = vld [vmem:[#allocation14 + $0x78] sm:$0xff] (!%p2209_p0)  ;;  %v2213_v39 = vld [vmem:[#allocation16] ss:$0 sm:$0xff] (!%p2209_p0) }
 0x226   : > { %v2424_v31 = vpack.c.bf16 (!%p2209_p0), %v924_v30, %v923_v29  ;;  %v2210_v32 = vld [vmem:[#allocation13] ss:$0 sm:$0xff] (!%p2209_p0) }
 0x227   : > { %2395 = vmatpush3.bf16.msra.mxu0 %v2392_v9 }
 0x228   : > { %2403 = vmatpush3.bf16.msra.mxu1 %v2400_v13 }
 0x229   : > { %2405 = vmatprep.subr.bf16.mxu1 %v2404_v16 }
 0x22a   : > { %2318 = vmatmul.mubr.msk.f32.vlgmr.msra.gmra.mrb[0].mxu0 %vm825_vm0, %v4069_v1 }
 0x22c   : > { %2407 = vmatpush3.bf16.msra.mxu1 %v2404_v16 }
 0x22d   : > { %2409 = vmatprep.subr.bf16.mxu1 %v2408_v19 }
 0x230   : > { %2411 = vmatpush3.bf16.msra.mxu1 %v2408_v19 }
 0x231   : > { %2413 = vmatprep.subr.bf16.mxu1 %v2412_v22 }
 0x234   : > { %2415 = vmatpush3.bf16.msra.mxu1 %v2412_v22 }
 0x235   : > { %2417 = vmatprep.subr.bf16.mxu1 %v2416_v25 }
 0x238   : > { %2419 = vmatpush3.bf16.msra.mxu1 %v2416_v25 }
 0x239   : > { %2421 = vmatprep.subr.bf16.mxu1 %v2420_v28 }
 0x23c   : > { %2423 = vmatpush3.bf16.msra.mxu1 %v2420_v28 }
 0x23d   : > { %2425 = vmatprep.subr.bf16.mxu1 %v2424_v31 }
 0x240   : > { %2427 = vmatpush3.bf16.msra.mxu1 %v2424_v31 }
 0x2fd   : > { %v2319_v33 = vpop.f32.mrb[0].mxu0 }
 0x2fe   : > { %v904_v34 = vadd.f32 %v2319_v33, %v2210_v32  ;;  %v898_v35 = vpop.f32.mrb[1].mxu0 }
 0x2ff   : > { %v899_v36 = vadd.f32 %v2210_v32, %v898_v35 }
 0x300   : > { %v908_v38 = vmax.f32 %v904_v34, 0.0 }
 0x301   : > { %v907_v37 = vmax.f32 %v899_v36, 0.0 }
 0x303   : > { %2352 = vmatprep.mubr.f32.mxu1 %v907_v37 }
 0x304   : > { %2353 = vmatmul.mubr.f32.vlgmr.msra.gmra.mrb[0].mxu1 %v908_v38 }
 0x3d7   : > { %v2354_v40 = vpop.f32.mrb[0].mxu1 }
 0x3d8   : > { %v1004_v41 = vadd.f32 %v2354_v40, %v2213_v39  ;;  %v998_v42 = vpop.f32.mrb[1].mxu1 }
 0x3d9   : > { %v999_v43 = vadd.f32 %v2213_v39, %v998_v42 }
 0x3da   : > { %1008 = vst [vmem:[%s4072_s30 + $0x8] sm:$0xff] %v1004_v41 }
 0x3db   : > { %1007 = vst [vmem:[%s4072_s30] sm:$0xff] %v999_v43 }
 0x3dc PF: > { %v1012_v44 = vld [vmem:[%s4035_s18] sm:$0x7]  ;;  %vm1017_vm1 = vcmask 1042432   ;;  %v3371_v46 = vmov 0.0   ;;  %vm3372_vm2 = vmmov 0   ;;  %vm1013_vm3 = vcmask 23552  }
 0x3dd   : > { %v1011_v45 = vld [vmem:[%s666_s6] sm:$0xff]  ;;  %2355 = vmatprep.subr.mxu0 %v3371_v46  ;;  %2357 = vmatprep.mubr.msk.f32.mxu0 %vm3372_vm2, %v3371_v46  ;;  %v1091_v47 = vld [vmem:[%s675_s13] sm:$0xff]  ;;  %v3373_v48 = vmov 0   ;;  %vm1118_vm5 = vcmask 130048   ;;  %v1115_v63 = vlaneseq  ;;  %v3374_v15 = vmov 0.0|0.0   ;;  %s4464_s8 = sld [smem:[#allocation44_spill]] }
 0x3de   : > { %2356 = vmatpush3.msk.msra.mxu0 %vm1017_vm1, %v1012_v44  ;;  %2742 = vset.pattern.permute.xlu0 %v3373_v48  ;;  %v2216_v49 = vld [vmem:[%s692_s10] ss:$0 sm:$0xff]  ;;  %vm1642_vm1 = vcmask 261120   ;;  %s4465_s25 = sld [smem:[#allocation56_spill]]  ;;  %s1877_s6 = sshll.u32 %s4072_s30, 4  ;;  %s4174_s6 = int_to_ptr.vmem [resolvable:$true] %s1877_s6 }
 0x3df   : > { %2358 = vmatmul.mubr.msk.f32.vlgmr.msra.gmra.mrb[0].mxu0 %vm1013_vm3, %v1011_v45  ;;  %1095 = vperm.xlu0 %2742, %v1091_v47   ;;  %v4097_v2 = vand.u32 127, %v1115_v63  ;;  %s4466_s29 = sld [smem:[#allocation74_spill]]  ;;  %s1849_s26 = scalar_lea.sflag [#allocation27], %s4032_s15 }
 0x3e0   : > { %2364 = vmatprep.mubr.msk.f32.mxu0 %vm3372_vm2, %v3371_v46  ;;  %2378 = vmatprep.mubr.msk.f32.mxu1 %vm3372_vm2, %v3371_v46  ;;  %s3165_s5 = scalar_lea.vmem %s4174_s6, 256  ;;  %s3375_s19 = smov [#allocation26]  }
 0x3e1   : > { %v1010_v13 = vld [vmem:[%s4072_s30 + $0x8] sm:$0xff]  ;;  %2428 = vmatprep.subr.bf16.mxu0 %v3374_v15  ;;  %2434 = vmatprep.subr.bf16.mxu1 %v3374_v15  ;;  %vm1117_vm14 = vcmp.lt.s32.totalorder %v4097_v2, 8  ;;  %p3166_p8 = scmp.ne.s32.totalorder %s4174_s6, %s3165_s5  ;;  %s3169_s18 = sshll.u32 %s3375_s19, 4  ;;  %s3170_s18 = int_to_ptr.vmem [resolvable:$false] %s3169_s18 }
 0x3e2   : > { %v1009_v12 = vld [vmem:[%s4072_s30] sm:$0xff]  ;;  %s3171_s14 = scalar_lea.vmem %s3170_s18, 512  ;;  %p3172_p13 = scmp.lt.s32.totalorder %s4174_s6, %s3170_s18 }
 0x3e3   : > { %v2429_v14 = vpack.c.bf16 %v1010_v13, %v1009_v12  ;;  %s2235_s2 = sshll.u32 %s4464_s8, 8  ;;  %p3173_p2 = scmp.lt.s32.totalorder %s3171_s14, %s3165_s5 }
 0x3e4   : > { %p4467_p12 = scmp.ne.s32.totalorder %s4465_s25, 0 }
 0x3e5   : > { %2430 = vmatpush3.bf16.msra.mxu0 %v2429_v14  ;;  %2436 = vmatpush3.bf16.msra.mxu1 %v2429_v14  ;;  %s4172_s13 = scalar_lea.hbm %s4466_s29, %s2235_s2  ;;  %p3174_p5 = por %p3173_p2, %p3172_p13 }
 0x3e6   : > { %2431 = vmatprep.subr.bf16.mxu0 %v3374_v15  ;;  %p3167_p9 = pnand %p3166_p8, %p4467_p12 }
 0x3e8   : > { %p3168_p4 = pneg %p3167_p9 }
 0x3ea   : > { %p3175_p11 = pnand %p3174_p5, %p3168_p4 }
 0x45e   : > { %v1096_v50 = vpop.permute.xlu0 %1095 }
 0x45f   : > { %v1104_v51 = vadd.f32 %v2216_v49, %v1096_v50 }
 0x4b2   : > { %v1087_v52 = vpop.f32.mrb[0].mxu0 }
 0x4b3   : > { %v1105_v53 = vmul.f32 2.0, %v1087_v52  ;;  %v2359_v54 = vpop.f32.mrb[1].mxu0 }
 0x4b5   : > { %v1106_v55 = vsub.f32 %v1104_v51, %v1105_v53 }
 0x4b7   : > { %v1107_v56 = vmax.f32 %v1106_v55, 0.0 }
 0x4b9   : > { %2743 = vrsqrt.f32 %v1107_v56  ;;  %vm1110_vm4 = vcmp.eq.f32.partialorder %v1107_v56, inf  ;;  %v1113_v59 = vand.u32 2147483648, %v1107_v56  ;;  %vm1112_vm6 = vcmp.eq.f32.partialorder %v1107_v56, 0.0 }
 0x4c3   : > { %v2744_v57 = vpop.eup %2743 }
 0x4c4   : > { %v1109_v58 = vmul.f32 %v2744_v57, %v1107_v56  ;;  %v2438_v57 = vpack.c.bf16 %v4069_v1, %v4067_v0 }
 0x4c6   : > { %v1111_v60 = vsel %vm1110_vm4, %v1107_v56, %v1109_v58 }
 0x4c7   : > { %v1114_v61 = vsel %vm1112_vm6, %v1113_v59, %v1111_v60 }
 0x4c8   : > { %v1119_v62 = vsel %vm1118_vm5, %v1114_v61, inf }
 0x4c9   : > { %1120 = vmin.xlane.f32.xlu0 %v1119_v62 }
 0x556   : > { %v4099_v3 = vpop.xlane.xlu0 %1120 }
 0x557   : > { %vm1122_vm7 = vcmp.eq.f32.partialorder %v1114_v61, %v4099_v3 }
 0x558   : > { %v1123_v4 = vsel %vm1122_vm7, %v4097_v2, 16 }
 0x559   : > { %v1124_v5 = vsel %vm1118_vm5, %v1123_v4, 2147483647 }
 0x55a   : > { %v1126_v6 = vshra.s32 %v1124_v5, 16  ;;  %v1125_v8 = vand.u32 65535, %v1124_v5 }
 0x55c   : > { %v1128_v7 = vcvt.s32.f32 %v1126_v6  ;;  %v1127_v10 = vcvt.s32.f32 %v1125_v8 }
 0x55e   : > { %1129 = vmin.xlane.f32.xlu1 %v1128_v7 }
 0x5eb   : > { %v1130_v9 = vpop.xlane.xlu1 %1129 }
 0x5ec   : > { %vm1131_vm8 = vcmp.eq.f32.partialorder %v1128_v7, %v1130_v9  ;;  %v1136_v16 = vcvt.f32.s32 %v1130_v9 }
 0x5ed   : > { %v1132_v11 = vsel %vm1131_vm8, %v1127_v10, inf }
 0x5ee   : > { %1133 = vmin.xlane.f32.xlu1 %v1132_v11  ;;  %v1137_v18 = vshll.u32 %v1136_v16, 16 }
 0x67b   : > { %v1134_v17 = vpop.xlane.xlu1 %1133 }
 0x67c   : > { %v1135_v19 = vcvt.f32.s32 %v1134_v17 }
 0x67e   : > { %v1138_v20 = vadd.s32 %v1137_v18, %v1135_v19 }
 0x680   : > { %vm1139_vm9 = vcmp.eq.s32.totalorder %v4097_v2, %v1138_v20 }
 0x681   : > { %v4108_v21 = vsel %vm1139_vm9, 1.0, %v3371_v46  ;;  %v1227_v22 = vsel %vm1139_vm9, 1e+30, %v1114_v61 }
 0x682   : > { %2365 = vmatmul.mubr.msk.f32.vlgmr.msra.gmra.mrb[2].mxu0 %vm1118_vm5, %v4108_v21  ;;  %v1228_v23 = vsel %vm1118_vm5, %v1227_v22, inf }
 0x683   : > { %1229 = vmin.xlane.f32.xlu1 %v1228_v23  ;;  %2433 = vmatpush3.bf16.msra.mxu0 %v2429_v14 }
 0x684   : > { %2371 = vmatprep.mubr.msk.f32.mxu0 %vm3372_vm2, %v3371_v46  ;;  %2437 = vmatprep.subr.bf16.mxu0 %v3374_v15 }
 0x710   : > { %v1230_v24 = vpop.xlane.xlu1 %1229 }
 0x711   : > { %vm1231_vm10 = vcmp.eq.f32.partialorder %v1227_v22, %v1230_v24  ;;  %v1251_v58 = vsub.f32 %v4099_v3, %v1230_v24 }
 0x712   : > { %v1232_v25 = vsel %vm1231_vm10, %v4097_v2, 16 }
 0x713   : > { %v1233_v26 = vsel %vm1118_vm5, %v1232_v25, 2147483647  ;;  %v1252_v59 = vmul.f32 1.442695, %v1251_v58  ;;  %v1540_v25 = vld [vmem:[#allocation19 + $0x8] sm:$0xff] }
 0x714   : > { %v1235_v27 = vshra.s32 %v1233_v26, 16  ;;  %v1234_v31 = vand.u32 65535, %v1233_v26  ;;  %v1542_v26 = vld [vmem:[#allocation19 + $0x18] sm:$0xff]  ;;  %v1560_v58 = vld [vmem:[#allocation19 + $0xa8] sm:$0xff] }
 0x715   : > { %2745 = vpow2.f32 %v1252_v59 }
 0x716   : > { %v1237_v28 = vcvt.s32.f32 %v1235_v27  ;;  %v1236_v33 = vcvt.s32.f32 %v1234_v31  ;;  %v1539_v27 = vld [vmem:[#allocation19] sm:$0xff]  ;;  %v1546_v31 = vld [vmem:[#allocation19 + $0x38] sm:$0xff] }
 0x718   : > { %1238 = vmin.xlane.f32.xlu1 %v1237_v28 }
 0x71f   : > { %v4134_v7 = vpop.eup %2745 }
 0x755   : > { %v1212_v29 = vpop.f32.mrb[2].mxu0 }
 0x756   : > { %v2366_v30 = vpop.f32.mrb[3].mxu0  ;;  %v1216_v56 = vsel %vm1117_vm14, %v1212_v29, -1e+30  ;;  %v1541_v29 = vld [vmem:[#allocation19 + $0x10] sm:$0xff] }
 0x757   : > { %v1544_v30 = vld [vmem:[#allocation19 + $0x28] sm:$0xff] }
 0x7a5   : > { %v1239_v32 = vpop.xlane.xlu1 %1238 }
 0x7a6   : > { %vm1240_vm11 = vcmp.eq.f32.partialorder %v1237_v28, %v1239_v32  ;;  %v1245_v35 = vcvt.f32.s32 %v1239_v32  ;;  %v2440_v28 = vpack.c.bf16 %v1542_v26, %v1540_v25  ;;  %v2442_v32 = vpack.c.bf16 %v1541_v29, %v1539_v27  ;;  %v1733_v25 = vld [vmem:[#allocation22] sm:$0xff]  ;;  %v1734_v27 = vld [vmem:[#allocation22 + $0x8] sm:$0xff]  ;;  %v1752_v29 = vld [vmem:[#allocation22 + $0x98] sm:$0xff] }
 0x7a7   : > { %v1241_v34 = vsel %vm1240_vm11, %v1236_v33, inf  ;;  %v2444_v33 = vpack.c.bf16 %v1546_v31, %v1544_v30  ;;  %v2482_v30 = vpack.c.bf16 %v1734_v27, %v1733_v25  ;;  %v1746_v27 = vld [vmem:[#allocation22 + $0x68] sm:$0xff] }
 0x7a8   : > { %1242 = vmin.xlane.f32.xlu1 %v1241_v34  ;;  %v1246_v37 = vshll.u32 %v1245_v35, 16  ;;  %v1543_v34 = vld [vmem:[#allocation19 + $0x20] sm:$0xff]  ;;  %v1548_v35 = vld [vmem:[#allocation19 + $0x48] sm:$0xff]  ;;  %2441 = vmatprep.subr.bf16.mxu1 %v2440_v28  ;;  %v1751_v28 = vld [vmem:[#allocation22 + $0x90] sm:$0xff] }
 0x7a9   : > { %v2484_v31 = vpack.c.bf16 %v1752_v29, %v1751_v28  ;;  %v1763_v29 = vld [vmem:[#allocation22 + $0xf0] sm:$0xff] }
 0x835   : > { %v1243_v36 = vpop.xlane.xlu1 %1242 }
 0x836   : > { %v1244_v38 = vcvt.f32.s32 %v1243_v36  ;;  %v1550_v36 = vld [vmem:[#allocation19 + $0x58] sm:$0xff] }
 0x838   : > { %v1247_v39 = vadd.s32 %v1246_v37, %v1244_v38  ;;  %v2448_v38 = vpack.c.bf16 %v1550_v36, %v1548_v35 }
 0x83a   : > { %vm1248_vm12 = vcmp.eq.s32.totalorder %v4097_v2, %v1247_v39  ;;  %v1547_v39 = vld [vmem:[#allocation19 + $0x40] sm:$0xff] }
 0x83b   : > { %v2219_v40 = vsel %vm1248_vm12, 1.0, %v3371_v46  ;;  %v1341_v41 = vsel %vm1248_vm12, 1e+30, %v1227_v22 }
 0x83c   : > { %2372 = vmatmul.mubr.msk.f32.vlgmr.msra.gmra.mrb[4].mxu0 %vm1118_vm5, %v2219_v40  ;;  %v1342_v42 = vsel %vm1118_vm5, %v1341_v41, inf  ;;  %v1254_v8 = vmul.f32 %v4134_v7, %v2219_v40  ;;  %v1549_v40 = vld [vmem:[#allocation19 + $0x50] sm:$0xff] }
 0x83d   : > { %1343 = vmin.xlane.f32.xlu1 %v1342_v42  ;;  %2385 = vmatprep.mubr.msk.f32.mxu0 %vm3372_vm2, %v3371_v46  ;;  %v1554_v42 = vld [vmem:[#allocation19 + $0x78] sm:$0xff] }
 0x83e   : > { %2439 = vmatpush3.bf16.msra.mxu0 %v2438_v57  ;;  %v1255_v12 = vadd.f32 %v4108_v21, %v1254_v8  ;;  %v1557_v57 = vld [vmem:[#allocation19 + $0x90] sm:$0xff] }
 0x8ca   : > { %v1344_v43 = vpop.xlane.xlu1 %1343 }
 0x8cb   : > { %vm1345_vm13 = vcmp.eq.f32.partialorder %v1341_v41, %v1344_v43  ;;  %v1365_v60 = vsub.f32 %v4099_v3, %v1344_v43  ;;  %v1552_v41 = vld [vmem:[#allocation19 + $0x68] sm:$0xff]  ;;  %v2450_v43 = vpack.c.bf16 %v1549_v40, %v1547_v39  ;;  %v1755_v39 = vld [vmem:[#allocation22 + $0xb0] sm:$0xff]  ;;  %v1756_v40 = vld [vmem:[#allocation22 + $0xb8] sm:$0xff] }
 0x8cc   : > { %v1346_v44 = vsel %vm1345_vm13, %v4097_v2, 16 }
 0x8cd   : > { %v1347_v45 = vsel %vm1118_vm5, %v1346_v44, 2147483647  ;;  %v1366_v61 = vmul.f32 1.442695, %v1365_v60  ;;  %v2452_v44 = vpack.c.bf16 %v1554_v42, %v1552_v41  ;;  %v1562_v60 = vld [vmem:[#allocation19 + $0xb8] sm:$0xff]  ;;  %v2492_v42 = vpack.c.bf16 %v1756_v40, %v1755_v39 }
 0x8ce   : > { %v1349_v47 = vshra.s32 %v1347_v45, 16  ;;  %v1348_v52 = vand.u32 65535, %v1347_v45  ;;  %v1551_v45 = vld [vmem:[#allocation19 + $0x60] sm:$0xff] }
 0x8cf   : > { %2747 = vpow2.f32 %v1366_v61  ;;  %v1559_v61 = vld [vmem:[#allocation19 + $0xa0] sm:$0xff] }
 0x8d0   : > { %v1351_v48 = vcvt.s32.f32 %v1349_v47  ;;  %v1350_v54 = vcvt.s32.f32 %v1348_v52  ;;  %v1553_v47 = vld [vmem:[#allocation19 + $0x70] sm:$0xff] }
 0x8d2   : > { %1352 = vmin.xlane.f32.xlu1 %v1351_v48 }
 0x8d9   : > { %v4138_v1 = vpop.eup %2747 }
 0x90f   : > { %v1326_v49 = vpop.f32.mrb[4].mxu0 }
 0x910   : > { %v2373_v50 = vpop.f32.mrb[5].mxu0  ;;  %v1330_v51 = vsel %vm1117_vm14, %v1326_v49, -1e+30 }
 0x911   : > { %1331 = vmax.xlane.f32.xlu0 %v1330_v51 }
 0x95f   : > { %v1353_v53 = vpop.xlane.xlu1 %1352 }
 0x960   : > { %vm1354_vm15 = vcmp.eq.f32.partialorder %v1351_v48, %v1353_v53  ;;  %v1359_v62 = vcvt.f32.s32 %v1353_v53  ;;  %v2454_v48 = vpack.c.bf16 %v1553_v47, %v1551_v45  ;;  %v1556_v53 = vld [vmem:[#allocation19 + $0x88] sm:$0xff] }
 0x961   : > { %v1355_v55 = vsel %vm1354_vm15, %v1350_v54, inf  ;;  %v1558_v54 = vld [vmem:[#allocation19 + $0x98] sm:$0xff]  ;;  %v1757_v45 = vld [vmem:[#allocation22 + $0xc0] sm:$0xff]  ;;  %v1758_v47 = vld [vmem:[#allocation22 + $0xc8] sm:$0xff] }
 0x962   : > { %1356 = vmin.xlane.f32.xlu1 %v1355_v55  ;;  %v1360_v5 = vshll.u32 %v1359_v62, 16  ;;  %v2456_v55 = vpack.c.bf16 %v1558_v54, %v1556_v53  ;;  %v1561_v62 = vld [vmem:[#allocation19 + $0xb0] sm:$0xff]  ;;  %v1760_v54 = vld [vmem:[#allocation22 + $0xd8] sm:$0xff] }
 0x963   : > { %v2462_v8 = vpack.c.bf16 %v1561_v62, %v1559_v61  ;;  %v1759_v53 = vld [vmem:[#allocation22 + $0xd0] sm:$0xff] }
 0x966   : > { %1217 = vmax.xlane.f32.xlu1 %v1216_v56 }
 0x99e   : > { %v1332_v16 = vpop.xlane.xlu0 %1331 }
 0x99f   : > { %v1333_v17 = vsub.f32 %v1330_v51, %v1332_v16  ;;  %v1569_v16 = vld [vmem:[#allocation19 + $0xf0] sm:$0xff] }
 0x9a1   : > { %v1334_v18 = vmul.f32 1.442695, %v1333_v17  ;;  %v1532_v17 = vld [vmem:[#allocation17 + $0x8] sm:$0xff] }
 0x9ef   : > { %v1357_v4 = vpop.xlane.xlu1 %1356 }
 0x9f0   : > { %v1358_v6 = vcvt.f32.s32 %v1357_v4  ;;  %v2460_v4 = vpack.c.bf16 %v1562_v60, %v1560_v58  ;;  %v1744_v58 = vld [vmem:[#allocation22 + $0x58] sm:$0xff]  ;;  %v1762_v60 = vld [vmem:[#allocation22 + $0xe8] sm:$0xff] }
 0x9f2   : > { %v1361_v9 = vadd.s32 %v1360_v5, %v1358_v6  ;;  %v1564_v5 = vld [vmem:[#allocation19 + $0xc8] sm:$0xff]  ;;  %v1566_v6 = vld [vmem:[#allocation19 + $0xd8] sm:$0xff] }
 0x9f3   : > { %v1218_v10 = vpop.xlane.xlu1 %1217 }
 0x9f4   : > { %v1219_v0 = vsub.f32 %v1216_v56, %v1218_v10  ;;  %vm1362_vm0 = vcmp.eq.s32.totalorder %v4097_v2, %v1361_v9  ;;  %v1545_v2 = vld [vmem:[#allocation19 + $0x30] sm:$0xff]  ;;  %v1555_v56 = vld [vmem:[#allocation19 + $0x80] sm:$0xff]  ;;  %v2464_v9 = vpack.c.bf16 %v1566_v6, %v1564_v5 }
 0x9f5   : > { %v2221_v3 = vsel %vm1362_vm0, 1.0, %v3371_v46  ;;  %v2446_v37 = vpack.c.bf16 %v1545_v2, %v1543_v34  ;;  %v2458_v59 = vpack.c.bf16 %v1557_v57, %v1555_v56  ;;  %v1563_v10 = vld [vmem:[#allocation19 + $0xc0] sm:$0xff]  ;;  %v1754_v2 = vld [vmem:[#allocation22 + $0xa8] sm:$0xff]  ;;  %v2500_v56 = vpack.c.bf16 %v1760_v54, %v1759_v53  ;;  %v1743_v57 = vld [vmem:[#allocation22 + $0x50] sm:$0xff] }
 0x9f6   : > { %v1220_v11 = vmul.f32 1.442695, %v1219_v0  ;;  %v1368_v13 = vmul.f32 %v4138_v1, %v2221_v3  ;;  %2379 = vmatmul.mubr.msk.f32.vlgmr.msra.gmra.mrb[0].mxu1 %vm1118_vm5, %v2221_v3  ;;  %v1565_v0 = vld [vmem:[#allocation19 + $0xd0] sm:$0xff]  ;;  %v1568_v3 = vld [vmem:[#allocation19 + $0xe8] sm:$0xff]  ;;  %v2502_v61 = vpack.c.bf16 %v1744_v58, %v1743_v57 }
 0x9f7   : > { %1635 = vmatprep.mubr.f32.mxu1 %v3371_v46  ;;  %2443 = vmatpush1.bf16.msra.mxu1 %v2442_v32  ;;  %v1735_v32 = vld [vmem:[#allocation22 + $0x10] sm:$0xff]  ;;  %v1753_v34 = vld [vmem:[#allocation22 + $0xa0] sm:$0xff] }
 0x9f8   : > { %2749 = vpow2.f32 %v1220_v11  ;;  %v1369_v14 = vadd.f32 %v1368_v13, %v1255_v12  ;;  %2445 = vmatprep.subr.bf16.mxu1 %v2444_v33  ;;  %v1570_v11 = vld [vmem:[#allocation19 + $0xf8] sm:$0xff]  ;;  %v2466_v12 = vpack.c.bf16 %v1565_v0, %v1563_v10  ;;  %v2488_v36 = vpack.c.bf16 %v1754_v2, %v1753_v34 }
 0x9f9   : > { %2751 = vpow2.f32 %v1334_v18  ;;  %v2468_v13 = vpack.c.bf16 %v1570_v11, %v1568_v3  ;;  %v1534_v18 = vld [vmem:[#allocation17 + $0x18] sm:$0xff]  ;;  %v1256_v10 = vadd.f32 1.0, %v4134_v7  ;;  %v1535_v7 = vld [vmem:[#allocation17 + $0x20] sm:$0xff] }
 0x9fa   : > { %2386 = vmatmul.mubr.msk.f32.vlgmr.msra.gmra.mrb[6].mxu0 %vm1118_vm5, %v1369_v14  ;;  %v1567_v14 = vld [vmem:[#allocation19 + $0xe0] sm:$0xff] }
 0x9fb   : > { %2447 = vmatpush1.bf16.msra.mxu1 %v2446_v37  ;;  %v1736_v33 = vld [vmem:[#allocation22 + $0x18] sm:$0xff]  ;;  %v1737_v37 = vld [vmem:[#allocation22 + $0x20] sm:$0xff]  ;;  %v1370_v3 = vadd.f32 %v4138_v1, %v1256_v10 }
 0x9fc   : > { %2449 = vmatprep.subr.bf16.mxu1 %v2448_v38  ;;  %v2486_v35 = vpack.c.bf16 %v1736_v33, %v1735_v32  ;;  %v1738_v38 = vld [vmem:[#allocation22 + $0x28] sm:$0xff]  ;;  %v1747_v32 = vld [vmem:[#allocation22 + $0x70] sm:$0xff]  ;;  %v1748_v33 = vld [vmem:[#allocation22 + $0x78] sm:$0xff] }
 0x9fd   : > { %v2490_v41 = vpack.c.bf16 %v1738_v38, %v1737_v37  ;;  %v2510_v34 = vpack.c.bf16 %v1748_v33, %v1747_v32 }
 0x9ff   : > { %2451 = vmatpush1.bf16.msra.mxu1 %v2450_v43  ;;  %v1739_v43 = vld [vmem:[#allocation22 + $0x30] sm:$0xff] }
 0xa00   : > { %2453 = vmatprep.subr.bf16.mxu1 %v2452_v44  ;;  %v1740_v44 = vld [vmem:[#allocation22 + $0x38] sm:$0xff] }
 0xa02   : > { %v4146_v15 = vpop.eup %2749 }
 0xa03   : > { %1222 = vadd.xlane.f32.xlu0 %v4146_v15  ;;  %v4153_v23 = vpop.eup %2751  ;;  %2455 = vmatpush1.bf16.msra.mxu1 %v2454_v48  ;;  %v2494_v48 = vpack.c.bf16 %v1740_v44, %v1739_v43 }
 0xa04   : > { %2457 = vmatprep.subr.bf16.mxu1 %v2456_v55 }
 0xa07   : > { %2459 = vmatpush1.bf16.msra.mxu1 %v2458_v59  ;;  %v1761_v59 = vld [vmem:[#allocation22 + $0xe0] sm:$0xff] }
 0xa08   : > { %2461 = vmatprep.subr.bf16.mxu1 %v2460_v4  ;;  %v2504_v62 = vpack.c.bf16 %v1762_v60, %v1761_v59 }
 0xa0b   : > { %2463 = vmatpush1.bf16.msra.mxu1 %v2462_v8 }
 0xa0c   : > { %2465 = vmatprep.subr.bf16.mxu1 %v2464_v9 }
 0xa0f   : > { %2467 = vmatpush1.bf16.msra.mxu1 %v2466_v12 }
 0xa10   : > { %2469 = vmatprep.subr.bf16.mxu1 %v2468_v13 }
 0xa90   : > { %v1223_v5 = vpop.xlane.xlu0 %1222 }
 0xac9   : > { %v1440_v19 = vpop.f32.mrb[0].mxu1 }
 0xaca   : > { %v2380_v20 = vpop.f32.mrb[1].mxu1  ;;  %v1444_v21 = vsel %vm1117_vm14, %v1440_v19, -1e+30  ;;  %v2470_v19 = vpack.c.bf16 %v1569_v16, %v1567_v14  ;;  %v1531_v16 = vld [vmem:[#allocation17] sm:$0xff] }
 0xacb   : > { %1445 = vmax.xlane.f32.xlu1 %v1444_v21  ;;  %v2472_v20 = vpack.c.bf16 %v1534_v18, %v1532_v17  ;;  %v1533_v17 = vld [vmem:[#allocation17 + $0x10] sm:$0xff]  ;;  %v1536_v18 = vld [vmem:[#allocation17 + $0x28] sm:$0xff] }
 0xacc   : > { %2471 = vmatpush1.bf16.msra.mxu1 %v2470_v19  ;;  %v1538_v19 = vld [vmem:[#allocation17 + $0x38] sm:$0xff] }
 0xacd   : > { %v4151_v22 = vpop.f32.mrb[6].mxu0  ;;  %2473 = vmatprep.subr.bf16.mxu1 %v2472_v20  ;;  %v2476_v25 = vpack.c.bf16 %v1538_v19, %v1536_v18 }
 0xace   : > { %v2387_v24 = vpop.f32.mrb[7].mxu0 }
 0xacf   : > { %1336 = vadd.xlane.f32.xlu1 %v4153_v23  ;;  %v1750_v24 = vld [vmem:[#allocation22 + $0x88] sm:$0xff] }
 0xb58   : > { %v1446_v49 = vpop.xlane.xlu1 %1445 }
 0xb59   : > { %v1447_v50 = vsub.f32 %v1444_v21, %v1446_v49  ;;  %v1749_v21 = vld [vmem:[#allocation22 + $0x80] sm:$0xff]  ;;  %v2496_v49 = vpack.c.bf16 %v1758_v47, %v1757_v45 }
 0xb5a   : > { %v2480_v26 = vpack.c.bf16 %v1750_v24, %v1749_v21  ;;  %v2474_v21 = vpack.c.bf16 %v1533_v17, %v1531_v16 }
 0xb5b   : > { %v1448_v51 = vmul.f32 1.442695, %v1447_v50  ;;  %v1741_v50 = vld [vmem:[#allocation22 + $0x40] sm:$0xff] }
 0xb5c   : > { %2481 = vmatprep.subr.bf16.mxu0 %v2480_v26  ;;  %v1337_v4 = vpop.xlane.xlu1 %1336  ;;  %v1537_v26 = vld [vmem:[#allocation17 + $0x30] sm:$0xff] }
 0xb5d   : > { %2753 = vpow2.f32 %v1448_v51  ;;  %2483 = vmatpush3.bf16.msra.mxu0 %v2482_v30  ;;  %v1742_v51 = vld [vmem:[#allocation22 + $0x48] sm:$0xff]  ;;  %v2478_v1 = vpack.c.bf16 %v1537_v26, %v1535_v7  ;;  %v1764_v30 = vld [vmem:[#allocation22 + $0xf8] sm:$0xff] }
 0xb5e   : > { %2485 = vmatprep.subr.bf16.mxu0 %v2484_v31  ;;  %v2498_v55 = vpack.c.bf16 %v1742_v51, %v1741_v50  ;;  %2755 = vrcp.f32 %v1337_v4  ;;  %v2508_v31 = vpack.c.bf16 %v1764_v30, %v1763_v29 }
 0xb5f   : > { %2757 = vrcp.f32 %v1223_v5 }
 0xb61   : > { %2487 = vmatpush3.bf16.msra.mxu0 %v2486_v35  ;;  %v1717_v35 = vld [vmem:[#allocation20] sm:$0x3] }
 0xb62   : > { %2489 = vmatprep.subr.bf16.mxu0 %v2488_v36 }
 0xb65   : > { %2491 = vmatpush3.bf16.msra.mxu0 %v2490_v41 }
 0xb66   : > { %2493 = vmatprep.subr.bf16.mxu0 %v2492_v42 }
 0xb67   : > { %v4156_v52 = vpop.eup %2753 }
 0xb68   : > { %1450 = vadd.xlane.f32.xlu0 %v4156_v52  ;;  %v2756_v8 = vpop.eup %2755 }
 0xb69   : > { %2495 = vmatpush3.bf16.msra.mxu0 %v2494_v48  ;;  %v2758_v9 = vpop.eup %2757  ;;  %v1339_v0 = vmul.f32 %v2756_v8, %v4153_v23 }
 0xb6a   : > { %2497 = vmatprep.subr.bf16.mxu0 %v2496_v49  ;;  %v1225_v11 = vmul.f32 %v2758_v9, %v4146_v15 }
 0xb6c   : > { %v1340_v13 = vadd.f32 %v1339_v0, %v1225_v11 }
 0xb6d   : > { %2499 = vmatpush3.bf16.msra.mxu0 %v2498_v55 }
 0xb6e   : > { %2501 = vmatprep.subr.bf16.mxu0 %v2500_v56 }
 0xb71   : > { %2503 = vmatpush3.bf16.msra.mxu0 %v2502_v61 }
 0xb72   : > { %2505 = vmatprep.subr.bf16.mxu0 %v2504_v62 }
 0xbf5   : > { %v1451_v6 = vpop.xlane.xlu0 %1450 }
 0xbf6   : > { %2759 = vrcp.f32 %v1451_v6 }
 0xbf7   : > { %2761 = vrcp.f32 %v1370_v3 }
 0xc00   : > { %v2760_v12 = vpop.eup %2759 }
 0xc01   : > { %v1453_v14 = vmul.f32 %v2760_v12, %v4156_v52  ;;  %v2762_v15 = vpop.eup %2761  ;;  %v1745_v52 = vld [vmem:[#allocation22 + $0x60] sm:$0xff] }
 0xc02   : > { %v1530_v23 = vmul.f32 %v2762_v15, %v4151_v22  ;;  %v2506_v28 = vpack.c.bf16 %v1746_v27, %v1745_v52 }
 0xc03   : > { %v1454_v20 = vadd.f32 %v1453_v14, %v1340_v13 }
 0xc04   : > { %2507 = vmatpush3.bf16.msra.mxu0 %v2506_v28 }
 0xc05   : > { %v1455_v24 = vmul.f32 0.33333334, %v1454_v20  ;;  %2509 = vmatprep.subr.bf16.mxu0 %v2508_v31 }
 0xc07   : > { %1636 = vmatmul.mubr.f32.vlgmr.msra.gmra.mrb[2].mxu1 %v1455_v24 }
 0xc08   : > { %2475 = vmatpush1.bf16.msra.mxu1 %v2474_v21  ;;  %1710 = vmatprep.mubr.f32.mxu1 %v3371_v46  ;;  %v1720_v46 = vshrl.u32 %v1115_v63, 7 }
 0xc09   : > { %2477 = vmatprep.subr.bf16.mxu1 %v2476_v25  ;;  %2511 = vmatpush3.bf16.msra.mxu0 %v2510_v34 }
 0xc0a   : > { %v1721_v2 = vsub.s32 0, %v1720_v46  ;;  %v1725_v22 = vsub.s32 1, %v1720_v46 }
 0xc0c   : > { %2479 = vmatpush1.bf16.msra.mxu1 %v2478_v1  ;;  %v1722_v36 = vrot.slane %v1717_v35, %v1721_v2  ;;  %v1726_v37 = vrot.slane %v1717_v35, %v1725_v22 }
 0xc0f   : > { %2224 = vmatmul.mubr.msk.f32.vlgmr.msra.gmra.mrb[2].mxu1 %vm1642_vm1, %v1530_v23 }
 0xce2   : > { %v1712_v38 = vpop.f32.mrb[2].mxu1 }
 0xce3   : > { %v1729_v39 = vadd.f32 %v1722_v36, %v1712_v38  ;;  %v1714_v40 = vpop.f32.mrb[3].mxu1 }
 0xce4   : > { %v1730_v41 = vadd.f32 %v1726_v37, %v1714_v40 }
 0xce5   : > { %v1731_v43 = vmax.f32 %v1729_v39, 0.0 }
 0xce6   : > { %v1732_v42 = vmax.f32 %v1730_v41, 0.0 }
 0xce8   : > { %1836 = vmatprep.mubr.f32.mxu0 %v1732_v42 }
 0xce9   : > { %1837 = vmatmul.mubr.f32.vlgmr.msra.gmra.mrb[8].mxu0 %v1731_v43 }
 0xcea   : > { %3178 = shalt.err (!%p3175_p11)
}
 0xceb   : > { %s3179_s10 = scalar_lea.hbm %s4172_s13, 256  ;;  %s3183_s30 = scalar_lea.hbm %s4466_s29, 512 }
 0xcec   : > { %p3180_p1 = scmp.ne.s32.totalorder %s4172_s13, %s3179_s10  ;;  %p3184_p6 = scmp.lt.u32.totalorder %s4172_s13, %s4466_s29 }
 0xced   : > { %p3185_p3 = scmp.lt.u32.totalorder %s3183_s30, %s3179_s10  ;;  %p3187_p8 = scmp.lt.u32.totalorder %s3179_s10, %s4172_s13 }
 0xcee   : > { %p3181_p7 = pnand %p3180_p1, %p4467_p12 }
 0xcef   : > { %p3186_p0 = por %p3185_p3, %p3184_p6 }
 0xcf0   : > { %p3182_p10 = pneg %p3181_p7 }
 0xcf1   : > { %p3188_p9 = por %p3187_p8, %p3186_p0 }
 0xcf3   : > { %p3189_p4 = pnand %p3188_p9, %p3182_p10 }
 0xcf5   : > { %3192 = shalt.err (!%p3189_p4)
}
 0xcf6   : > { %s3376_s17 = smov 128   ;;  %s4468_s4 = sld [smem:[#allocation43_spill]]  ;;  %v2225_v44 = vld [vmem:[#allocation23] ss:$0 sm:$0xff] }
 0xcf7   : > { %s3377_s5 = smov 8   ;;  %s4469_s19 = sld [smem:[#allocation52_spill]] }
 0xcf8   : > { %2561 = dma.vmem_to_hbm [thread:$0]  (%p4467_p12), %s4174_s6, 256, %s4172_s13, %s1849_s26, %s3376_s17, %s3376_s17, %s3377_s5  }
 0xcf9   : > { %s2228_s18 = sshll.u32 %s4464_s8, 1  ;;  %s1864_s7 = sshll.u32 %s800_s28, 4  ;;  %s4209_s7 = int_to_ptr.vmem [resolvable:$true] %s1864_s7 }
 0xcfa   : > { %s4470_s20 = sld [smem:[#allocation73_spill]]  ;;  %s1844_s15 = scalar_lea.sflag [#allocation4], %s4014_s16 }
 0xcfb   : > { %s3193_s8 = scalar_lea.vmem %s4209_s7, 128  ;;  %s3378_s25 = smov [#allocation25]  }
 0xcfc   : > { %s1860_s14 = sadd.s32 %s4468_s4, %s2228_s18  ;;  %p3194_p12 = scmp.ne.s32.totalorder %s4209_s7, %s3193_s8 }
 0xcfd   : > { %s2229_s10 = sshll.u32 %s1860_s14, 7  ;;  %p4472_p13 = scmp.ne.s32.totalorder %s4469_s19, 0 }
 0xcfe   : > { %s3197_s6 = sshll.u32 %s3378_s25, 4  ;;  %s3198_s6 = int_to_ptr.vmem [resolvable:$false] %s3197_s6 }
 0xcff   : > { %p3195_p2 = pnand %p3194_p12, %p4472_p13  ;;  %s3199_s13 = scalar_lea.vmem %s3198_s6, 256 }
 0xd00   : > { %s4471_s2 = smov %s4470_s20  ;;  %s4207_s0 = scalar_lea.hbm %s4470_s20, %s2229_s10 }
 0xd01   : > { %p3196_p5 = pneg %p3195_p2  ;;  %p3200_p11 = scmp.lt.s32.totalorder %s4209_s7, %s3198_s6 }
 0xd02   : > { %p3201_p1 = scmp.lt.s32.totalorder %s3199_s13, %s3193_s8 }
 0xd04   : > { %p3202_p7 = por %p3201_p1, %p3200_p11 }
 0xd06   : > { %p3203_p10 = pnand %p3202_p7, %p3196_p5 }
 0xdbc   : > { %v2306_v63 = vpop.f32.mrb[8].mxu0 }
 0xdbd   : > { %v2307_v45 = vpop.f32.mrb[9].mxu0 }
 0xdbe   : > { %v2308_v47 = vadd.f32 %v2307_v45, %v2306_v63 }
 0xdc0   : > { %v1839_v48 = vadd.f32 %v2308_v47, %v2225_v44 }
 0xdc2   : > { %1842 = vst [vmem:[%s800_s28] sm:$0xff] %v1839_v48 }
 0xdc3   : > { %3206 = shalt.err (!%p3203_p10)
}
 0xdc4   : > { %s3207_s16 = scalar_lea.hbm %s4207_s0, 128  ;;  %s3211_s26 = scalar_lea.hbm %s4471_s2, 512 }
 0xdc5   : > { %p3208_p6 = scmp.ne.s32.totalorder %s4207_s0, %s3207_s16  ;;  %p3212_p8 = scmp.lt.u32.totalorder %s4207_s0, %s4471_s2 }
 0xdc6   : > { %p3213_p9 = scmp.lt.u32.totalorder %s3211_s26, %s3207_s16  ;;  %p3215_p12 = scmp.lt.u32.totalorder %s3207_s16, %s4207_s0 }
 0xdc7   : > { %p3209_p3 = pnand %p3208_p6, %p4472_p13 }
 0xdc8   : > { %p3214_p4 = por %p3213_p9, %p3212_p8 }
 0xdc9   : > { %p3210_p0 = pneg %p3209_p3 }
 0xdca   : > { %p3216_p2 = por %p3215_p12, %p3214_p4 }
 0xdcc   : > { %p3217_p5 = pnand %p3216_p2, %p3210_p0 }
 0xdce   : > { %3220 = shalt.err (!%p3217_p5)
}
 0xdcf   : > { %2560 = dma.vmem_to_hbm [thread:$0]  (%p4472_p13), %s4209_s7, 128, %s4207_s0, %s1844_s15  }
 0xdd0 PF: > { %s4473_s5 = sld [smem:[#allocation46_spill]]  ;;  %s4474_s18 = sld [smem:[#allocation42_spill]] }
 0xdd1   : > { %s4475_s14 = sld [smem:[#allocation53_spill]] }
 0xdd6   : > { %p2634_p11 = scmp.ge.s32.totalorder %s4473_s5, 2  ;;  %s1892_s10 = sand.u32 1, %s4474_s18  }
 0xdd7   : > { %p4476_p1 = scmp.ne.s32.totalorder %s4475_s14, 0  ;;  %s1893_s21 = scalar_lea.sflag [#allocation4], %s1892_s10 }
 0xdd9   : > { %p2609_p7 = pnand %p2634_p11, %p4476_p1 }
 0xddb   : > { %3302 = dma.done.wait (!%p2609_p7), %s1893_s21, 128  }
 0xddc   : > { %3304 = vsyncadd (!%p2609_p7), %s1893_s21, 4294967168  ;;  %s4477_s30 = sld [smem:[#allocation39_spill]]  ;;  %s4478_s20 = sld [smem:[#allocation58_spill]] }
 0xde2   : > { %s1901_s8 = sand.u32 1, %s4477_s30   ;;  %p4479_p10 = scmp.ne.s32.totalorder %s4478_s20, 0 }
 0xde3   : > { %s1902_s19 = scalar_lea.sflag [#allocation27], %s1901_s8 }
 0xde4   : > { %p2612_p6 = pnand %p2634_p11, %p4479_p10 }
 0xde6   : > { %3306 = dma.done.wait (!%p2612_p6), %s1902_s19, 256  }
 0xde7   : > { %3308 = vsyncadd (!%p2612_p6), %s1902_s19, 4294967040  ;;  %s46_s28 = sadd.s32 1, %s4473_s5   ;;  %s4480_s18 = sld [smem:[#allocation40_spill]] }
 0xde8   : > { %p43_p13 = scmp.ge.s32.totalorder %s46_s28, 6   ;;  %s4481_s19 = sld [smem:[#allocation41_spill]] }
 0xde9   : > { %s4482_s20 = sld [smem:[#allocation55_spill]]  ;;  %s4483_s0 = sld [smem:[#allocation54_spill]] }
 0xdea   : > { %s4484_s24 = sld [smem:[#allocation45_spill]]  ;;  %s4485_s26 = sld [smem:[#allocation49_spill]] }
 0xdeb   : > { %s4486_s7 = sld [smem:[#allocation50_spill]]  ;;  %s4487_s21 = smov %s3327_s22 }
 0xdec   : > { %s4488_s22 = smov %s3331_s23  ;;  %s4490_s25 = smov %s3347_s27 }
 0xded   :  { %45 = sbr.rel (!%p43_p13) target bundleno = 37 (0x25), region = 226 }
 0xdef   : > { %s4489_s23 = smov %s4483_s0 }
 0xdf1   : > { %s4491_s27 = smov %s4486_s7 }
 0xdf4   :  { %1907 = vsyncpa [#allocation3], 1 }
 0xdf5   :  { %1909 = vsyncpa [#allocation3 + $0x1], 1 }
 0xdf6   :  { %1910 = vsyncpa [#allocation6], 1 }
 0xdf7   :  { %1912 = vsyncpa [#allocation6 + $0x1], 1 }
 0xdf8   :  { %1913 = vsyncpa [#allocation9], 1 }
 0xdf9   :  { %1915 = vsyncpa [#allocation9 + $0x1], 1 }
 0xdfa   :  { %1916 = vsyncpa [#allocation12], 1 }
 0xdfb   :  { %1917 = vsyncpa [#allocation15], 1 }
 0xdfc   :  { %1918 = vsyncpa [#allocation18], 1 }
 0xdfd   :  { %1919 = vsyncpa [#allocation21], 1 }
 0xdfe   :  { %1920 = vsyncpa [#allocation24], 1 }
 0xdff   :  { %1921 = vsyncpa [#allocation4], 1 }
 0xe00   :  { %1923 = vsyncpa [#allocation4 + $0x1], 1 }
 0xe01   :  { %1924 = vsyncpa [#allocation27], 1 }
 0xe02   :  { %1926 = vsyncpa [#allocation27 + $0x1], 1 }

</bundles_post_ra>
